<compile_context>
chip_gen: v7x
topology: tpu7x:2x2x1
jax: 0.10.0
libtpu: 0.0.40
codegen_flags: <defaults>
</compile_context>

<pallas_src>
import functools

import jax
import jax.numpy as jnp
from jax.experimental import pallas as pl
from jax.experimental.pallas import tpu as pltpu


def _conv1x1_wx_kernel(w_ref, x_ref, o_ref, *, tk):
    # Grid = (C_out blocks [parallel], C_in blocks [reduction, last]).
    # x_ref holds the FULL [C_in, M] activation (resident across the whole
    # grid); slice out this step's K chunk.  The output block is resident
    # across the reduction axis -> accumulate in place.
    k = pl.program_id(1)

    @pl.when(k == 0)
    def _():
        o_ref[...] = jnp.zeros_like(o_ref)

    start = pl.multiple_of(k * tk, tk)
    o_ref[...] += jnp.dot(
        w_ref[...],
        x_ref[pl.ds(start, tk), :],
        preferred_element_type=jnp.float32,
    )


def _default_tiles():
    """Pick (tn, tk) per TPU generation.

    v7x has 2 TensorCores per chip -> split C_out across them ('parallel')
    and use 2 k-steps per core.  Single-core chips (v5e / v6e, and any
    unrecognized device) keep C_out whole and use 3 k-steps so the weight
    DMA stays overlapped with the MXU work.
    """
    try:
        kind = jax.devices()[0].device_kind.lower()
    except Exception:  # pragma: no cover - defensive fallback
        kind = ""
    if "v7" in kind or "tpu7" in kind:
        return 192, 1152  # grid (2, 2): 2 TCs x 2 k-steps
    return 384, 768       # grid (1, 3): 1 TC  x 3 k-steps


def conv2d_1x1(x_nchw, weight, *, tn=None, tk=None):
    """1x1 conv, stride 1, no bias.

    x_nchw : [N, C_in, H, W]   (N must be 1, matching the module input)
    weight : [C_out, C_in, 1, 1]
    returns: [N, C_out, H, W]
    """
    if tn is None or tk is None:
        dtn, dtk = _default_tiles()
        tn = dtn if tn is None else tn
        tk = dtk if tk is None else tk

    n, c_in, h, w = x_nchw.shape
    c_out = weight.shape[0]
    assert n == 1, "module forward is specified for batch size 1"
    assert weight.shape[1] == c_in and weight.shape[2:] == (1, 1)
    assert c_in % tk == 0 and c_out % tn == 0
    assert tk % 128 == 0 and tn % 8 == 0

    m = h * w  # 49 spatial positions

    # Free reshapes (no data movement): W [C_out, C_in], X [C_in, M].
    w2d = weight.reshape(c_out, c_in)
    x2d = x_nchw.reshape(c_in, m)

    itemsize = jnp.dtype(x_nchw.dtype).itemsize
    # Exact for the resident-X tiling: weight streamed once, X DMA'd once,
    # output written once.
    cost = pl.CostEstimate(
        flops=2 * m * c_in * c_out,
        transcendentals=0,
        bytes_accessed=(c_out * c_in + c_in * m + c_out * m) * itemsize,
    )

    kernel = functools.partial(_conv1x1_wx_kernel, tk=tk)

    out = pl.pallas_call(
        kernel,
        out_shape=jax.ShapeDtypeStruct((c_out, m), jnp.float32),
        grid_spec=pltpu.PrefetchScalarGridSpec(
            num_scalar_prefetch=0,
            grid=(c_out // tn, c_in // tk),
            in_specs=[
                # Weight tile: [tn, tk], streamed along the reduction axis.
                pl.BlockSpec((tn, tk), lambda i, k: (i, k)),
                # Full X: [C_in, M]; constant block index -> DMA'd once,
                # resident in VMEM for every grid step.
                pl.BlockSpec((c_in, m), lambda i, k: (0, 0)),
            ],
            # Output block resident across the reduction axis k.
            out_specs=pl.BlockSpec((tn, m), lambda i, k: (i, 0)),
        ),
        compiler_params=pltpu.CompilerParams(
            dimension_semantics=("parallel", "arbitrary"),
        ),
        cost_estimate=cost,
    )(w2d, x2d)

    # [C_out, 49] -> [1, C_out, 7, 7]  (free reshape).  astype is a no-op for
    # the module's f32 inputs and just preserves the input dtype contract.
    return out.astype(x_nchw.dtype).reshape(1, c_out, h, w)


if __name__ == "__main__":
    key = jax.random.PRNGKey(0)
    kx, kw = jax.random.split(key)

    # Module input shape: [1, 2304, 7, 7]
    x = jax.random.normal(kx, (1, 2304, 7, 7), dtype=jnp.float32)
    # Conv2d(2304, 384, 1, bias=False) weight -> [384, 2304, 1, 1]
    fan_in = 2304
    bound = 1.0 / (fan_in ** 0.5)
    weight = jax.random.uniform(
        kw, (384, 2304, 1, 1), dtype=jnp.float32, minval=-bound, maxval=bound
    )

    y = conv2d_1x1(x, weight)
    y = jax.block_until_ready(y)

    # Cross-check against a plain JAX reference.
    y_ref = jnp.einsum("oc,nchw->nohw", weight.reshape(384, 2304), x)
    assert y.shape == (1, 384, 7, 7)
    assert jnp.allclose(y, y_ref, atol=1e-4, rtol=1e-4)

    print("KERNEL_OK")
</pallas_src>

<mosaic_0001>
module attributes {stable_mosaic.version = 11 : i64} {
  func.func @_conv1x1_wx_kernel(%arg0: i32, %arg1: i32, %arg2: memref<384x768xf32, #tpu.memory_space<vmem>>, %arg3: memref<2304x49xf32, #tpu.memory_space<vmem>>, %arg4: memref<384x49xf32, #tpu.memory_space<vmem>>) attributes {dimension_semantics = [#tpu.dimension_semantics<parallel>, #tpu.dimension_semantics<arbitrary>], iteration_bounds = array<i64: 1, 3>, scalar_prefetch = 0 : i64, scratch_operands = 0 : i64, tpu.core_type = #tpu.core_type<tc>, window_params = [{transform_indices = @transform_0, window_bounds = array<i64: 384, 768>}, {pipeline_mode = #tpu.pipeline_mode<synchronous>, transform_indices = @transform_1, window_bounds = array<i64: 2304, 49>}, {transform_indices = @transform_2, window_bounds = array<i64: 384, 49>}]} {
    %c0_i32 = arith.constant 0 : i32
    %0 = arith.cmpi eq, %arg1, %c0_i32 : i32
    %1 = arith.extui %0 : i1 to i32
    %c0_i32_0 = arith.constant 0 : i32
    %2 = arith.cmpi ne, %1, %c0_i32_0 : i32
    scf.if %2 {
      %cst_7 = arith.constant 0.000000e+00 : f32
      %12 = vector.broadcast %cst_7 : f32 to vector<384x49xf32>
      %c0_8 = arith.constant 0 : index
      %c0_9 = arith.constant 0 : index
      %13 = vector.load %arg4[%c0_8, %c0_9] : memref<384x49xf32, #tpu.memory_space<vmem>>, vector<384x49xf32>
      tpu.vector_store %arg4[%c0_8, %c0_9], %12 {strides = array<i32>} : memref<384x49xf32, #tpu.memory_space<vmem>>, vector<384x49xf32>,
    } else {
    }
    %c768_i32 = arith.constant 768 : i32
    %3 = arith.muli %arg1, %c768_i32 : i32
    %4 = tpu.assume_multiple %3, 768 : i32
    %c0 = arith.constant 0 : index
    %c0_1 = arith.constant 0 : index
    %5 = vector.load %arg4[%c0, %c0_1] : memref<384x49xf32, #tpu.memory_space<vmem>>, vector<384x49xf32>
    %c0_2 = arith.constant 0 : index
    %c0_3 = arith.constant 0 : index
    %6 = vector.load %arg2[%c0_2, %c0_3] : memref<384x768xf32, #tpu.memory_space<vmem>>, vector<384x768xf32>
    %7 = arith.index_cast %4 : i32 to index
    %c0_4 = arith.constant 0 : index
    %8 = vector.load %arg3[%7, %c0_4] : memref<2304x49xf32, #tpu.memory_space<vmem>>, vector<768x49xf32>
    %cst = arith.constant dense<0.000000e+00> : vector<384x49xf32>
    %9 = tpu.matmul %6, %8, %cst {dimension_numbers = #tpu.dot_dimension_numbers<[1], [0], [0], [1], [0, 0, 1, 1], [], []>} : vector<384x768xf32>, vector<768x49xf32>, vector<384x49xf32> -> vector<384x49xf32>
    %10 = arith.addf %5, %9 : vector<384x49xf32>
    %c0_5 = arith.constant 0 : index
    %c0_6 = arith.constant 0 : index
    %11 = vector.load %arg4[%c0_5, %c0_6] : memref<384x49xf32, #tpu.memory_space<vmem>>, vector<384x49xf32>
    tpu.vector_store %arg4[%c0_5, %c0_6], %10 {strides = array<i32>} : memref<384x49xf32, #tpu.memory_space<vmem>>, vector<384x49xf32>,
    return
  }
  func.func @transform_0(%arg0: i32, %arg1: i32) -> (i32, i32) {
    %c0_i32 = arith.constant 0 : i32
    return %arg0, %arg1 : i32, i32
  }
  func.func @transform_1(%arg0: i32, %arg1: i32) -> (i32, i32) {
    %c0_i32 = arith.constant 0 : i32
    %c0_i32_0 = arith.constant 0 : i32
    %c0_i32_1 = arith.constant 0 : i32
    return %c0_i32, %c0_i32_0 : i32, i32
  }
  func.func @transform_2(%arg0: i32, %arg1: i32) -> (i32, i32) {
    %c0_i32 = arith.constant 0 : i32
    %c0_i32_0 = arith.constant 0 : i32
    return %arg0, %c0_i32 : i32, i32
  }
}

</mosaic_0001>

<bundles_post_ra>
// kernel: tpu_custom_call.1
= control target key start
LH: loop header
LB: loop body
LE: loop exit
PB: predicated region body
PF: predicated region fallthrough
CT: control target
= control target key end

     0   :  { %7 = vsyncpa [#allocation3], 0  ;;  %s3357_s0 = inlined_call_operand.hbm [shape: f32[384,2304], index: 0, kind: input, shape index: {}]   ;;  %s3358_s1 = inlined_call_operand.vmem [shape: f32[2304,49], index: 1, kind: input, shape index: {}]   ;;  %s3359_s2 = inlined_call_operand.vmem [shape: f32[384,49], index: 2, kind: output, shape index: {}]  }
   0x1   :  { %9 = vsyncpa [#allocation3 + $0x1], 0  ;;  %s2113_s9 = smov 0   ;;  %s2115_s10 = smov 0  }
   0x2   :  { %s2117_s11 = smov 0   ;;  %s2119_s12 = smov 0  }
   0x3   :  { %s2121_s13 = smov 0   ;;  %s2123_s14 = smov 0  }
   0x4 LB: > { %s1761_s15 = sadd.s32 4294967295, %s2090_s14   ;;  %s24_s16 = sadd.s32 1, %s2086_s13  ;;  %s2090_s14 = sphi %s2123_s14, %s15_s14   ;;  %s2086_s13 = sphi %s2121_s13, %s3367_s13   ;;  %s2082_s12 = sphi %s2119_s12, %s3366_s12   ;;  %s2078_s11 = sphi %s2117_s11, %s3365_s11   ;;  %s2074_s10 = sphi %s2115_s10, %s3364_s10   ;;  %s2070_s9 = sphi %s2113_s9, %s3363_s9  }
   0x5   : > { %p25_p0 = scmp.ge.s32.totalorder %s24_s16, 3  ;;  %s36_s17 = sadd.s32 1, %s2078_s11 }
   0x6   : > { %p43_p1 = scmp.ne.s32.totalorder %s2078_s11, %s2074_s10  ;;  %p44_p2 = scmp.eq.s32.totalorder %s2090_s14, 0 }
   0x7   : > { %s3369_s16 = smov (%p25_p0, %s24_s16), 0  ;;  %p49_p4 = scmp.ne.s32.totalorder %s2074_s10, %s2070_s9 }
   0x8   : > { %p45_p3 = por %p44_p2, %p43_p1  ;;  %s32_s18 = ssub.s32 %s2086_s13, %s3369_s16 }
   0x9   : > { %p50_p5 = scmp.eq.s32.totalorder %s1761_s15, 0  ;;  %p34_p6 = scmp.eq.s32.totalorder %s32_s18, 0 }
   0xa   : > { %p1956_p8 = scmp.lt.s32.totalorder %s2090_s14, 3  ;;  %s123_s21 = sand.u32 1, %s2078_s11  }
   0xb   : > { %p2152_p7 = por %p50_p5, %p49_p4  ;;  %s1771_s22 = smul.u32 768, %s2086_s13 }
   0xc   : > { %s2158_s20 = scalar_select %p34_p6, %s2078_s11, %s36_s17  }
   0xd   : > { %s1948_s23 = smul.u32 2304, %s123_s21  ;;  %s2165_s26 = scalar_lea.hbm %s3357_s0, %s1771_s22 }
   0xe   : > { %p2167_p9 = pnand %p1956_p8, %p45_p3  ;;  %s2174_s30 = scalar_lea.sflag [#allocation3], %s123_s21 }
   0xf   : > { %s127_s28 = scalar_lea.vmem [#allocation2], %s1948_s23  ;;  %s2010_s3 = scalar_lea.hbm %s2165_s26, 36864 }
  0x10   : > { %s137_s29 = sshll.u32 %s127_s28, 4  ;;  %p2011_p11 = scmp.ne.s32.totalorder %s2165_s26, %s2010_s3  ;;  %s2171_s29 = int_to_ptr.vmem [resolvable:$true] %s137_s29 }
  0x11   : > { %p2012_p12 = pneg %p2167_p9  ;;  %s2015_s6 = scalar_lea.hbm %s3357_s0, 110592 }
  0x12   : > { %p2016_p1 = scmp.lt.u32.totalorder %s2165_s26, %s3357_s0  ;;  %p2017_p2 = scmp.lt.u32.totalorder %s2015_s6, %s2010_s3 }
  0x13   : > { %p2013_p13 = pnand %p2012_p12, %p2011_p11  ;;  %p2019_p4 = scmp.lt.u32.totalorder %s2010_s3, %s2165_s26 }
  0x14   : > { %p2018_p3 = por %p2017_p2, %p2016_p1 }
  0x15   : > { %p2014_p0 = pneg %p2013_p13 }
  0x16   : > { %p2020_p5 = por %p2019_p4, %p2018_p3 }
  0x18   : > { %p2021_p6 = pnand %p2020_p5, %p2014_p0 }
  0x1a   : > { %2024 = shalt.err (!%p2021_p6)
}
  0x1b   : > { %s2025_s9 = scalar_lea.vmem %s2171_s29, 36864  ;;  %s2092_s15 = smov [#allocation2]  }
  0x1c   : > { %p2026_p8 = scmp.ne.s32.totalorder %s2171_s29, %s2025_s9  ;;  %s2030_s17 = sshll.u32 %s2092_s15, 4  ;;  %s2031_s17 = int_to_ptr.vmem [resolvable:$false] %s2030_s17 }
  0x1d   : > { %s2032_s18 = scalar_lea.vmem %s2031_s17, 73728  ;;  %p2033_p10 = scmp.lt.s32.totalorder %s2171_s29, %s2031_s17 }
  0x1e   : > { %p2028_p11 = pnand %p2026_p8, %p2012_p12  ;;  %p2034_p1 = scmp.lt.s32.totalorder %s2032_s18, %s2025_s9 }
  0x20   : > { %p2029_p13 = pneg %p2028_p11  ;;  %p2035_p2 = por %p2034_p1, %p2033_p10 }
  0x22   : > { %p2036_p3 = pnand %p2035_p2, %p2029_p13 }
  0x24   : > { %2039 = shalt.err (!%p2036_p3)
}
  0x25   : > { %s2093_s21 = smov 2304   ;;  %s2094_s22 = smov 768  }
  0x26   : > { %s2095_s23 = smov 48   ;;  %p145_p12 = scmp.lt.s32.totalorder %s2090_s14, 4 }
  0x27   : > { %1955 = dma.hbm_to_vmem [thread:$0]  (!%p2167_p9), %s2165_s26, 36864, %s2171_s29, %s2174_s30, %s2093_s21, %s2094_s22, %s2095_s23  }
  0x28   : > { %p3362_p0 = scmp.ge.s32.totalorder %s2090_s14, 1 }
  0x2a   : > { %p146_p4 = pnand %p3362_p0, %p145_p12 }
  0x2b   : > { %s151_s24 = sand.u32 (!%p146_p4), 1, %s2074_s10  }
  0x2c   : > { %149 = sbr.rel (%p146_p4) target bundleno = 650 (0x28a), region = 28  ;;  %s152_s28 = scalar_lea.sflag (!%p146_p4), [#allocation3], %s151_s24 }
  0x2d   : > { %s1949_s25 = smul.u32 (!%p146_p4), 2304, %s151_s24 }
  0x2f   : > { %s2206_s3 = scalar_lea.vmem (!%p146_p4), [#allocation2], %s1949_s25 }
  0x33   : > { %2065 = dma.done.wait (%p2152_p7), %s152_s28, 36864  }
  0x34   : > { %2067 = vsyncadd (%p2152_p7), %s152_s28, 4294930432  ;;  %p1766_p10 = scmp.ne.s32.totalorder %s2082_s12, 0 }
  0x35   : > { %vm188_vm0 = vcmask (!%p1766_p10), 400384   ;;  %v2096_v0 = vmov (!%p1766_p10), 0.0  }
  0x36   : > { %187 = sbr.rel (%p1766_p10) target bundleno = 78 (0x4e), region = 36  ;;  %189 = vst.msk [vmem:[%s3359_s2] sm:$0xff] (!%p1766_p10), %vm188_vm0, %v2096_v0  ;;  %190 = vst.msk [vmem:[%s3359_s2 + $0x8] sm:$0xff] (!%p1766_p10), %vm188_vm0, %v2096_v0 }
  0x37   : > { %191 = vst.msk [vmem:[%s3359_s2 + $0x10] sm:$0xff] (!%p1766_p10), %vm188_vm0, %v2096_v0  ;;  %192 = vst.msk [vmem:[%s3359_s2 + $0x18] sm:$0xff] (!%p1766_p10), %vm188_vm0, %v2096_v0 }
  0x38   : > { %193 = vst.msk [vmem:[%s3359_s2 + $0x20] sm:$0xff] (!%p1766_p10), %vm188_vm0, %v2096_v0  ;;  %194 = vst.msk [vmem:[%s3359_s2 + $0x28] sm:$0xff] (!%p1766_p10), %vm188_vm0, %v2096_v0 }
  0x39   : > { %195 = vst.msk [vmem:[%s3359_s2 + $0x30] sm:$0xff] (!%p1766_p10), %vm188_vm0, %v2096_v0  ;;  %196 = vst.msk [vmem:[%s3359_s2 + $0x38] sm:$0xff] (!%p1766_p10), %vm188_vm0, %v2096_v0 }
  0x3a   : > { %197 = vst.msk [vmem:[%s3359_s2 + $0x40] sm:$0xff] (!%p1766_p10), %vm188_vm0, %v2096_v0  ;;  %198 = vst.msk [vmem:[%s3359_s2 + $0x48] sm:$0xff] (!%p1766_p10), %vm188_vm0, %v2096_v0 }
  0x3b   : > { %199 = vst.msk [vmem:[%s3359_s2 + $0x50] sm:$0xff] (!%p1766_p10), %vm188_vm0, %v2096_v0  ;;  %200 = vst.msk [vmem:[%s3359_s2 + $0x58] sm:$0xff] (!%p1766_p10), %vm188_vm0, %v2096_v0 }
  0x3c   : > { %201 = vst.msk [vmem:[%s3359_s2 + $0x60] sm:$0xff] (!%p1766_p10), %vm188_vm0, %v2096_v0  ;;  %202 = vst.msk [vmem:[%s3359_s2 + $0x68] sm:$0xff] (!%p1766_p10), %vm188_vm0, %v2096_v0 }
  0x3d   : > { %203 = vst.msk [vmem:[%s3359_s2 + $0x70] sm:$0xff] %vm188_vm0, %v2096_v0  ;;  %204 = vst.msk [vmem:[%s3359_s2 + $0x78] sm:$0xff] %vm188_vm0, %v2096_v0 }
  0x3e   : > { %205 = vst.msk [vmem:[%s3359_s2 + $0x80] sm:$0xff] %vm188_vm0, %v2096_v0  ;;  %206 = vst.msk [vmem:[%s3359_s2 + $0x88] sm:$0xff] %vm188_vm0, %v2096_v0 }
  0x3f   : > { %207 = vst.msk [vmem:[%s3359_s2 + $0x90] sm:$0xff] %vm188_vm0, %v2096_v0  ;;  %208 = vst.msk [vmem:[%s3359_s2 + $0x98] sm:$0xff] %vm188_vm0, %v2096_v0 }
  0x40   : > { %209 = vst.msk [vmem:[%s3359_s2 + $0xa0] sm:$0xff] %vm188_vm0, %v2096_v0  ;;  %210 = vst.msk [vmem:[%s3359_s2 + $0xa8] sm:$0xff] %vm188_vm0, %v2096_v0 }
  0x41   : > { %211 = vst.msk [vmem:[%s3359_s2 + $0xb0] sm:$0xff] %vm188_vm0, %v2096_v0  ;;  %212 = vst.msk [vmem:[%s3359_s2 + $0xb8] sm:$0xff] %vm188_vm0, %v2096_v0 }
  0x42   : > { %213 = vst.msk [vmem:[%s3359_s2 + $0xc0] sm:$0xff] %vm188_vm0, %v2096_v0  ;;  %214 = vst.msk [vmem:[%s3359_s2 + $0xc8] sm:$0xff] %vm188_vm0, %v2096_v0 }
  0x43   : > { %215 = vst.msk [vmem:[%s3359_s2 + $0xd0] sm:$0xff] %vm188_vm0, %v2096_v0  ;;  %216 = vst.msk [vmem:[%s3359_s2 + $0xd8] sm:$0xff] %vm188_vm0, %v2096_v0 }
  0x44   : > { %217 = vst.msk [vmem:[%s3359_s2 + $0xe0] sm:$0xff] %vm188_vm0, %v2096_v0  ;;  %218 = vst.msk [vmem:[%s3359_s2 + $0xe8] sm:$0xff] %vm188_vm0, %v2096_v0 }
  0x45   : > { %219 = vst.msk [vmem:[%s3359_s2 + $0xf0] sm:$0xff] %vm188_vm0, %v2096_v0  ;;  %220 = vst.msk [vmem:[%s3359_s2 + $0xf8] sm:$0xff] %vm188_vm0, %v2096_v0 }
  0x46   : > { %221 = vst.msk [vmem:[%s3359_s2 + $0x100] sm:$0xff] %vm188_vm0, %v2096_v0  ;;  %222 = vst.msk [vmem:[%s3359_s2 + $0x108] sm:$0xff] %vm188_vm0, %v2096_v0 }
  0x47   : > { %223 = vst.msk [vmem:[%s3359_s2 + $0x110] sm:$0xff] %vm188_vm0, %v2096_v0  ;;  %224 = vst.msk [vmem:[%s3359_s2 + $0x118] sm:$0xff] %vm188_vm0, %v2096_v0 }
  0x48   : > { %225 = vst.msk [vmem:[%s3359_s2 + $0x120] sm:$0xff] %vm188_vm0, %v2096_v0  ;;  %226 = vst.msk [vmem:[%s3359_s2 + $0x128] sm:$0xff] %vm188_vm0, %v2096_v0 }
  0x49   : > { %227 = vst.msk [vmem:[%s3359_s2 + $0x130] sm:$0xff] %vm188_vm0, %v2096_v0  ;;  %228 = vst.msk [vmem:[%s3359_s2 + $0x138] sm:$0xff] %vm188_vm0, %v2096_v0 }
  0x4a   : > { %229 = vst.msk [vmem:[%s3359_s2 + $0x140] sm:$0xff] %vm188_vm0, %v2096_v0  ;;  %230 = vst.msk [vmem:[%s3359_s2 + $0x148] sm:$0xff] %vm188_vm0, %v2096_v0 }
  0x4b   : > { %231 = vst.msk [vmem:[%s3359_s2 + $0x150] sm:$0xff] %vm188_vm0, %v2096_v0  ;;  %232 = vst.msk [vmem:[%s3359_s2 + $0x158] sm:$0xff] %vm188_vm0, %v2096_v0 }
  0x4c   : > { %233 = vst.msk [vmem:[%s3359_s2 + $0x160] sm:$0xff] %vm188_vm0, %v2096_v0  ;;  %234 = vst.msk [vmem:[%s3359_s2 + $0x168] sm:$0xff] %vm188_vm0, %v2096_v0 }
  0x4d   : > { %235 = vst.msk [vmem:[%s3359_s2 + $0x170] sm:$0xff] %vm188_vm0, %v2096_v0  ;;  %236 = vst.msk [vmem:[%s3359_s2 + $0x178] sm:$0xff] %vm188_vm0, %v2096_v0 }
  0x4e PF: > { %s237_s23 = smul.u32 768, %s2082_s12  ;;  %v431_v1 = vld [vmem:[%s2206_s3 + $0x488] sm:$0xff]  ;;  %v2097_v3 = vmov 0.0|0.0   ;;  %v430_v56 = vld [vmem:[%s2206_s3 + $0x480] sm:$0xff]  ;;  %v437_v59 = vld [vmem:[%s2206_s3 + $0x4b8] sm:$0xff]  ;;  %vm1634_vm1 = vcmask 400384  }
  0x4f   : > { %v287_v2 = vld [vmem:[%s2206_s3 + $0x8] sm:$0xff]  ;;  %1916 = vmatprep.subr.bf16.mxu1 %v2097_v3  ;;  %1772 = vmatprep.subr.bf16.mxu0 %v2097_v3  ;;  %v286_v58 = vld [vmem:[%s2206_s3] sm:$0xff]  ;;  %v293_v63 = vld [vmem:[%s2206_s3 + $0x38] sm:$0xff] }
  0x50   : > { %s2413_s28 = scalar_lea.vmem %s3358_s1, %s237_s23  ;;  %855 = vmatprep.mubr.f32.mxu1 %v431_v1  ;;  %735 = vmatprep.mubr.f32.mxu0 %v287_v2  ;;  %v436_v2 = vld [vmem:[%s2206_s3 + $0x4b0] sm:$0xff] }
  0x51   : > { %v575_v4 = vld [vmem:[%s2413_s28] sm:$0xff]  ;;  %v576_v5 = vld [vmem:[%s2413_s28 + $0x8] sm:$0xff]  ;;  %v577_v6 = vld [vmem:[%s2413_s28 + $0x10] sm:$0xff] }
  0x52   : > { %v1773_v7 = vpack.c.bf16 %v576_v5, %v575_v4  ;;  %v578_v8 = vld [vmem:[%s2413_s28 + $0x18] sm:$0xff]  ;;  %v579_v10 = vld [vmem:[%s2413_s28 + $0x20] sm:$0xff]  ;;  %v580_v11 = vld [vmem:[%s2413_s28 + $0x28] sm:$0xff] }
  0x53   : > { %v1776_v9 = vpack.c.bf16 %v578_v8, %v577_v6  ;;  %v1779_v12 = vpack.c.bf16 %v580_v11, %v579_v10  ;;  %v581_v13 = vld [vmem:[%s2413_s28 + $0x30] sm:$0xff]  ;;  %v582_v14 = vld [vmem:[%s2413_s28 + $0x38] sm:$0xff]  ;;  %v583_v16 = vld [vmem:[%s2413_s28 + $0x40] sm:$0xff] }
  0x54   : > { %1932 = vmatpush1.bf16.msra.mxu1 %v1773_v7  ;;  %1774 = vmatpush1.bf16.msra.mxu0 %v1773_v7  ;;  %v1782_v15 = vpack.c.bf16 %v582_v14, %v581_v13  ;;  %v584_v17 = vld [vmem:[%s2413_s28 + $0x48] sm:$0xff]  ;;  %v585_v19 = vld [vmem:[%s2413_s28 + $0x50] sm:$0xff]  ;;  %v586_v20 = vld [vmem:[%s2413_s28 + $0x58] sm:$0xff] }
  0x55   : > { %1917 = vmatprep.subr.bf16.mxu1 %v2097_v3  ;;  %1775 = vmatprep.subr.bf16.mxu0 %v2097_v3  ;;  %v1785_v18 = vpack.c.bf16 %v584_v17, %v583_v16  ;;  %v1788_v21 = vpack.c.bf16 %v586_v20, %v585_v19  ;;  %v587_v22 = vld [vmem:[%s2413_s28 + $0x60] sm:$0xff]  ;;  %v588_v23 = vld [vmem:[%s2413_s28 + $0x68] sm:$0xff]  ;;  %v589_v25 = vld [vmem:[%s2413_s28 + $0x70] sm:$0xff] }
  0x56   : > { %v1791_v24 = vpack.c.bf16 %v588_v23, %v587_v22  ;;  %v590_v26 = vld [vmem:[%s2413_s28 + $0x78] sm:$0xff]  ;;  %v591_v28 = vld [vmem:[%s2413_s28 + $0x80] sm:$0xff]  ;;  %v592_v29 = vld [vmem:[%s2413_s28 + $0x88] sm:$0xff] }
  0x57   : > { %v1794_v27 = vpack.c.bf16 %v590_v26, %v589_v25  ;;  %v1797_v30 = vpack.c.bf16 %v592_v29, %v591_v28  ;;  %v593_v31 = vld [vmem:[%s2413_s28 + $0x90] sm:$0xff]  ;;  %v594_v32 = vld [vmem:[%s2413_s28 + $0x98] sm:$0xff]  ;;  %v595_v34 = vld [vmem:[%s2413_s28 + $0xa0] sm:$0xff] }
  0x58   : > { %1933 = vmatpush1.bf16.msra.mxu1 %v1776_v9  ;;  %1777 = vmatpush1.bf16.msra.mxu0 %v1776_v9  ;;  %v1800_v33 = vpack.c.bf16 %v594_v32, %v593_v31  ;;  %v596_v35 = vld [vmem:[%s2413_s28 + $0xa8] sm:$0xff]  ;;  %v597_v37 = vld [vmem:[%s2413_s28 + $0xb0] sm:$0xff]  ;;  %v598_v38 = vld [vmem:[%s2413_s28 + $0xb8] sm:$0xff] }
  0x59   : > { %1918 = vmatprep.subr.bf16.mxu1 %v2097_v3  ;;  %1778 = vmatprep.subr.bf16.mxu0 %v2097_v3  ;;  %v1803_v36 = vpack.c.bf16 %v596_v35, %v595_v34  ;;  %v1806_v39 = vpack.c.bf16 %v598_v38, %v597_v37  ;;  %v599_v40 = vld [vmem:[%s2413_s28 + $0xc0] sm:$0xff]  ;;  %v600_v41 = vld [vmem:[%s2413_s28 + $0xc8] sm:$0xff]  ;;  %v601_v43 = vld [vmem:[%s2413_s28 + $0xd0] sm:$0xff] }
  0x5a   : > { %v1809_v42 = vpack.c.bf16 %v600_v41, %v599_v40  ;;  %v602_v44 = vld [vmem:[%s2413_s28 + $0xd8] sm:$0xff]  ;;  %v603_v46 = vld [vmem:[%s2413_s28 + $0xe0] sm:$0xff]  ;;  %v604_v47 = vld [vmem:[%s2413_s28 + $0xe8] sm:$0xff] }
  0x5b   : > { %v1812_v45 = vpack.c.bf16 %v602_v44, %v601_v43  ;;  %v1815_v48 = vpack.c.bf16 %v604_v47, %v603_v46  ;;  %v605_v49 = vld [vmem:[%s2413_s28 + $0xf0] sm:$0xff]  ;;  %v606_v50 = vld [vmem:[%s2413_s28 + $0xf8] sm:$0xff]  ;;  %v607_v52 = vld [vmem:[%s2413_s28 + $0x100] sm:$0xff] }
  0x5c   : > { %1934 = vmatpush1.bf16.msra.mxu1 %v1779_v12  ;;  %1780 = vmatpush1.bf16.msra.mxu0 %v1779_v12  ;;  %v1818_v51 = vpack.c.bf16 %v606_v50, %v605_v49  ;;  %v608_v53 = vld [vmem:[%s2413_s28 + $0x108] sm:$0xff]  ;;  %v639_v54 = vld [vmem:[%s2413_s28 + $0x200] sm:$0xff]  ;;  %v609_v61 = vld [vmem:[%s2413_s28 + $0x110] sm:$0xff] }
  0x5d   : > { %1919 = vmatprep.subr.bf16.mxu1 %v2097_v3  ;;  %1781 = vmatprep.subr.bf16.mxu0 %v2097_v3  ;;  %v640_v55 = vld [vmem:[%s2413_s28 + $0x208] sm:$0xff]  ;;  %v1821_v57 = vpack.c.bf16 %v608_v53, %v607_v52  ;;  %v610_v62 = vld [vmem:[%s2413_s28 + $0x118] sm:$0xff]  ;;  %v641_v0 = vld [vmem:[%s2413_s28 + $0x210] sm:$0xff] }
  0x5e   : > { %v1869_v60 = vpack.c.bf16 %v640_v55, %v639_v54  ;;  %v642_v1 = vld [vmem:[%s2413_s28 + $0x218] sm:$0xff]  ;;  %v292_v4 = vld [vmem:[%s2206_s3 + $0x30] sm:$0xff]  ;;  %v1824_v5 = vpack.c.bf16 %v610_v62, %v609_v61  ;;  %v443_v6 = vld [vmem:[%s2206_s3 + $0x4e8] sm:$0xff] }
  0x5f   : > { %v299_v7 = vld [vmem:[%s2206_s3 + $0x68] sm:$0xff]  ;;  %v1872_v8 = vpack.c.bf16 %v642_v1, %v641_v0  ;;  %v611_v9 = vld [vmem:[%s2413_s28 + $0x120] sm:$0xff]  ;;  %v305_v16 = vld [vmem:[%s2206_s3 + $0x98] sm:$0xff] }
  0x60   : > { %1935 = vmatpush1.bf16.msra.mxu1 %v1782_v15  ;;  %1783 = vmatpush1.bf16.msra.mxu0 %v1782_v15  ;;  %v612_v10 = vld [vmem:[%s2413_s28 + $0x128] sm:$0xff]  ;;  %v643_v11 = vld [vmem:[%s2413_s28 + $0x220] sm:$0xff]  ;;  %v449_v15 = vld [vmem:[%s2206_s3 + $0x518] sm:$0xff] }
  0x61   : > { %1920 = vmatprep.subr.bf16.mxu1 %v2097_v3  ;;  %1784 = vmatprep.subr.bf16.mxu0 %v2097_v3  ;;  %v644_v12 = vld [vmem:[%s2413_s28 + $0x228] sm:$0xff]  ;;  %v442_v13 = vld [vmem:[%s2206_s3 + $0x4e0] sm:$0xff]  ;;  %v1827_v17 = vpack.c.bf16 %v612_v10, %v611_v9  ;;  %v613_v19 = vld [vmem:[%s2413_s28 + $0x130] sm:$0xff] }
  0x62   : > { %v298_v14 = vld [vmem:[%s2206_s3 + $0x60] sm:$0xff]  ;;  %v614_v20 = vld [vmem:[%s2413_s28 + $0x138] sm:$0xff]  ;;  %v448_v23 = vld [vmem:[%s2206_s3 + $0x510] sm:$0xff] }
  0x63   : > { %v646_v22 = vld [vmem:[%s2413_s28 + $0x238] sm:$0xff]  ;;  %v455_v25 = vld [vmem:[%s2206_s3 + $0x548] sm:$0xff]  ;;  %v615_v29 = vld [vmem:[%s2413_s28 + $0x140] sm:$0xff] }
  0x64   : > { %1936 = vmatpush1.bf16.msra.mxu1 %v1785_v18  ;;  %1786 = vmatpush1.bf16.msra.mxu0 %v1785_v18  ;;  %v1875_v18 = vpack.c.bf16 %v644_v12, %v643_v11  ;;  %v311_v26 = vld [vmem:[%s2206_s3 + $0xc8] sm:$0xff]  ;;  %v647_v31 = vld [vmem:[%s2413_s28 + $0x240] sm:$0xff]  ;;  %v461_v35 = vld [vmem:[%s2206_s3 + $0x578] sm:$0xff] }
  0x65   : > { %1921 = vmatprep.subr.bf16.mxu1 %v2097_v3  ;;  %1787 = vmatprep.subr.bf16.mxu0 %v2097_v3  ;;  %v648_v32 = vld [vmem:[%s2413_s28 + $0x248] sm:$0xff]  ;;  %v310_v34 = vld [vmem:[%s2206_s3 + $0xc0] sm:$0xff]  ;;  %v618_v40 = vld [vmem:[%s2413_s28 + $0x158] sm:$0xff] }
  0x66   : > { %v1881_v38 = vpack.c.bf16 %v648_v32, %v647_v31  ;;  %v649_v41 = vld [vmem:[%s2413_s28 + $0x250] sm:$0xff]  ;;  %v323_v46 = vld [vmem:[%s2206_s3 + $0x128] sm:$0xff]  ;;  %v619_v49 = vld [vmem:[%s2413_s28 + $0x160] sm:$0xff] }
  0x67   : > { %v460_v43 = vld [vmem:[%s2206_s3 + $0x570] sm:$0xff]  ;;  %v620_v50 = vld [vmem:[%s2413_s28 + $0x168] sm:$0xff]  ;;  %v466_v53 = vld [vmem:[%s2206_s3 + $0x5a0] sm:$0xff] }
  0x68   : > { %1937 = vmatpush1.bf16.msra.mxu1 %v1788_v21  ;;  %1789 = vmatpush1.bf16.msra.mxu0 %v1788_v21  ;;  %v645_v21 = vld [vmem:[%s2413_s28 + $0x230] sm:$0xff]  ;;  %v652_v52 = vld [vmem:[%s2413_s28 + $0x268] sm:$0xff]  ;;  %v322_v54 = vld [vmem:[%s2206_s3 + $0x120] sm:$0xff] }
  0x69   : > { %1922 = vmatprep.subr.bf16.mxu1 %v2097_v3  ;;  %1790 = vmatprep.subr.bf16.mxu0 %v2097_v3  ;;  %v1878_v28 = vpack.c.bf16 %v646_v22, %v645_v21  ;;  %v316_v44 = vld [vmem:[%s2206_s3 + $0xf0] sm:$0xff]  ;;  %v473_v55 = vld [vmem:[%s2206_s3 + $0x5d8] sm:$0xff]  ;;  %v479_v1 = vld [vmem:[%s2206_s3 + $0x608] sm:$0xff] }
  0x6a   : > { %v653_v61 = vld [vmem:[%s2413_s28 + $0x270] sm:$0xff]  ;;  %v654_v62 = vld [vmem:[%s2413_s28 + $0x278] sm:$0xff]  ;;  %v656_v9 = vld [vmem:[%s2413_s28 + $0x288] sm:$0xff] }
  0x6b   : > { %v328_v0 = vld [vmem:[%s2206_s3 + $0x150] sm:$0xff]  ;;  %v478_v10 = vld [vmem:[%s2206_s3 + $0x600] sm:$0xff]  ;;  %v485_v12 = vld [vmem:[%s2206_s3 + $0x638] sm:$0xff] }
  0x6c   : > { %1938 = vmatpush1.bf16.msra.mxu1 %v1791_v24  ;;  %1792 = vmatpush1.bf16.msra.mxu0 %v1791_v24  ;;  %v304_v24 = vld [vmem:[%s2206_s3 + $0x90] sm:$0xff]  ;;  %v334_v11 = vld [vmem:[%s2206_s3 + $0x180] sm:$0xff]  ;;  %v491_v22 = vld [vmem:[%s2206_s3 + $0x668] sm:$0xff] }
  0x6d   : > { %1923 = vmatprep.subr.bf16.mxu1 %v2097_v3  ;;  %1793 = vmatprep.subr.bf16.mxu0 %v2097_v3  ;;  %v340_v21 = vld [vmem:[%s2206_s3 + $0x1b0] sm:$0xff]  ;;  %v346_v31 = vld [vmem:[%s2206_s3 + $0x1e0] sm:$0xff]  ;;  %v497_v32 = vld [vmem:[%s2206_s3 + $0x698] sm:$0xff] }
  0x70   : > { %1939 = vmatpush1.bf16.msra.mxu1 %v1794_v27  ;;  %1795 = vmatpush1.bf16.msra.mxu0 %v1794_v27  ;;  %v1830_v27 = vpack.c.bf16 %v614_v20, %v613_v19  ;;  %v658_v19 = vld [vmem:[%s2413_s28 + $0x298] sm:$0xff]  ;;  %v484_v20 = vld [vmem:[%s2206_s3 + $0x630] sm:$0xff] }
  0x71   : > { %1924 = vmatprep.subr.bf16.mxu1 %v2097_v3  ;;  %1796 = vmatprep.subr.bf16.mxu0 %v2097_v3 }
  0x74   : > { %1940 = vmatpush1.bf16.msra.mxu1 %v1797_v30  ;;  %1798 = vmatpush1.bf16.msra.mxu0 %v1797_v30  ;;  %v616_v30 = vld [vmem:[%s2413_s28 + $0x148] sm:$0xff] }
  0x75   : > { %1925 = vmatprep.subr.bf16.mxu1 %v2097_v3  ;;  %1799 = vmatprep.subr.bf16.mxu0 %v2097_v3  ;;  %v1833_v37 = vpack.c.bf16 %v616_v30, %v615_v29  ;;  %v660_v29 = vld [vmem:[%s2413_s28 + $0x2a8] sm:$0xff]  ;;  %v490_v30 = vld [vmem:[%s2206_s3 + $0x660] sm:$0xff] }
  0x78   : > { %1941 = vmatpush1.bf16.msra.mxu1 %v1800_v33  ;;  %1801 = vmatpush1.bf16.msra.mxu0 %v1800_v33  ;;  %v454_v33 = vld [vmem:[%s2206_s3 + $0x540] sm:$0xff] }
  0x79   : > { %1926 = vmatprep.subr.bf16.mxu1 %v2097_v3  ;;  %1802 = vmatprep.subr.bf16.mxu0 %v2097_v3 }
  0x7c   : > { %1942 = vmatpush1.bf16.msra.mxu1 %v1803_v36  ;;  %1804 = vmatpush1.bf16.msra.mxu0 %v1803_v36  ;;  %v317_v36 = vld [vmem:[%s2206_s3 + $0xf8] sm:$0xff] }
  0x7d   : > { %1927 = vmatprep.subr.bf16.mxu1 %v2097_v3  ;;  %1805 = vmatprep.subr.bf16.mxu0 %v2097_v3 }
  0x80   : > { %1943 = vmatpush1.bf16.msra.mxu1 %v1806_v39  ;;  %1807 = vmatpush1.bf16.msra.mxu0 %v1806_v39  ;;  %v617_v39 = vld [vmem:[%s2413_s28 + $0x150] sm:$0xff] }
  0x81   : > { %1928 = vmatprep.subr.bf16.mxu1 %v2097_v3  ;;  %1808 = vmatprep.subr.bf16.mxu0 %v2097_v3  ;;  %v1836_v47 = vpack.c.bf16 %v618_v40, %v617_v39  ;;  %v662_v39 = vld [vmem:[%s2413_s28 + $0x2b8] sm:$0xff]  ;;  %v496_v40 = vld [vmem:[%s2206_s3 + $0x690] sm:$0xff] }
  0x84   : > { %1944 = vmatpush1.bf16.msra.mxu1 %v1809_v42  ;;  %1810 = vmatpush1.bf16.msra.mxu0 %v1809_v42  ;;  %v650_v42 = vld [vmem:[%s2413_s28 + $0x258] sm:$0xff] }
  0x85   : > { %1929 = vmatprep.subr.bf16.mxu1 %v2097_v3  ;;  %1811 = vmatprep.subr.bf16.mxu0 %v2097_v3 }
  0x88   : > { %1945 = vmatpush1.bf16.msra.mxu1 %v1812_v45  ;;  %1813 = vmatpush1.bf16.msra.mxu0 %v1812_v45  ;;  %v467_v45 = vld [vmem:[%s2206_s3 + $0x5a8] sm:$0xff] }
  0x89   : > { %1930 = vmatprep.subr.bf16.mxu1 %v2097_v3  ;;  %1814 = vmatprep.subr.bf16.mxu0 %v2097_v3 }
  0x8c   : > { %1946 = vmatpush1.bf16.msra.mxu1 %v1815_v48  ;;  %1816 = vmatpush1.bf16.msra.mxu0 %v1815_v48  ;;  %v1884_v48 = vpack.c.bf16 %v650_v42, %v649_v41  ;;  %v352_v41 = vld [vmem:[%s2206_s3 + $0x210] sm:$0xff]  ;;  %v503_v42 = vld [vmem:[%s2206_s3 + $0x6c8] sm:$0xff] }
  0x8d   : > { %1931 = vmatprep.subr.bf16.mxu1 %v2097_v3  ;;  %1817 = vmatprep.subr.bf16.mxu0 %v2097_v3 }
  0x90   : > { %1947 = vmatpush1.bf16.msra.mxu1 %v1818_v51  ;;  %1819 = vmatpush1.bf16.msra.mxu0 %v1818_v51  ;;  %v651_v51 = vld [vmem:[%s2413_s28 + $0x260] sm:$0xff] }
  0x91   : > { %1820 = vmatprep.subr.bf16.mxu1 %v2097_v3  ;;  %1868 = vmatprep.subr.bf16.mxu0 %v2097_v3 }
  0x93   : > { %856 = vmatmul.mubr.f32.vlgmr.msra.gmra.mrb[0].mxu1 %v430_v56  ;;  %736 = vmatmul.mubr.f32.vlgmr.msra.gmra.mrb[0].mxu0 %v286_v58  ;;  %v329_v56 = vld [vmem:[%s2206_s3 + $0x158] sm:$0xff]  ;;  %v1887_v58 = vpack.c.bf16 %v652_v52, %v651_v51  ;;  %v358_v51 = vld [vmem:[%s2206_s3 + $0x240] sm:$0xff] }
  0x94   : > { %1822 = vmatpush1.bf16.msra.mxu1 %v1821_v57  ;;  %860 = vmatprep.mubr.f32.mxu1 %v437_v59  ;;  %v1839_v57 = vpack.c.bf16 %v620_v50, %v619_v49  ;;  %v621_v59 = vld [vmem:[%s2413_s28 + $0x170] sm:$0xff]  ;;  %v664_v49 = vld [vmem:[%s2413_s28 + $0x2c8] sm:$0xff]  ;;  %v502_v50 = vld [vmem:[%s2206_s3 + $0x6c0] sm:$0xff] }
  0x95   : > { %1870 = vmatpush1.bf16.msra.mxu0 %v1869_v60  ;;  %740 = vmatprep.mubr.f32.mxu0 %v293_v63  ;;  %v622_v60 = vld [vmem:[%s2413_s28 + $0x178] sm:$0xff]  ;;  %v472_v63 = vld [vmem:[%s2206_s3 + $0x5d0] sm:$0xff] }
  0x96   : > { %1823 = vmatprep.subr.bf16.mxu1 %v2097_v3  ;;  %1871 = vmatprep.subr.bf16.mxu0 %v2097_v3  ;;  %v509_v52 = vld [vmem:[%s2206_s3 + $0x6f8] sm:$0xff] }
  0x97   : > { %861 = vmatmul.mubr.f32.gmra.mrb[2].mxu1 %v436_v2  ;;  %741 = vmatmul.mubr.f32.gmra.mrb[2].mxu0 %v292_v4  ;;  %v335_v2 = vld [vmem:[%s2206_s3 + $0x188] sm:$0xff]  ;;  %v1842_v4 = vpack.c.bf16 %v622_v60, %v621_v59  ;;  %v666_v59 = vld [vmem:[%s2413_s28 + $0x2d8] sm:$0xff]  ;;  %v508_v60 = vld [vmem:[%s2206_s3 + $0x6f0] sm:$0xff] }
  0x98   : > { %865 = vmatprep.mubr.f32.mxu1 %v443_v6  ;;  %1825 = vmatpush1.bf16.msra.mxu1 %v1824_v5  ;;  %v1890_v5 = vpack.c.bf16 %v654_v62, %v653_v61  ;;  %v623_v6 = vld [vmem:[%s2413_s28 + $0x180] sm:$0xff]  ;;  %v364_v61 = vld [vmem:[%s2206_s3 + $0x270] sm:$0xff]  ;;  %v515_v62 = vld [vmem:[%s2206_s3 + $0x728] sm:$0xff] }
  0x99   : > { %745 = vmatprep.mubr.f32.mxu0 %v299_v7  ;;  %1873 = vmatpush1.bf16.msra.mxu0 %v1872_v8  ;;  %v624_v7 = vld [vmem:[%s2413_s28 + $0x188] sm:$0xff]  ;;  %v655_v8 = vld [vmem:[%s2413_s28 + $0x280] sm:$0xff] }
  0x9a   : > { %1826 = vmatprep.subr.bf16.mxu1 %v2097_v3  ;;  %1874 = vmatprep.subr.bf16.mxu0 %v2097_v3 }
  0x9b   : > { %866 = vmatmul.mubr.f32.gmra.mrb[4].mxu1 %v442_v13  ;;  %746 = vmatmul.mubr.f32.gmra.mrb[4].mxu0 %v298_v14  ;;  %v341_v13 = vld [vmem:[%s2206_s3 + $0x1b8] sm:$0xff]  ;;  %v1845_v14 = vpack.c.bf16 %v624_v7, %v623_v6  ;;  %v668_v6 = vld [vmem:[%s2413_s28 + $0x2e8] sm:$0xff]  ;;  %v514_v7 = vld [vmem:[%s2206_s3 + $0x720] sm:$0xff] }
  0x9c   : > { %870 = vmatprep.mubr.f32.mxu1 %v449_v15  ;;  %750 = vmatprep.mubr.f32.mxu0 %v305_v16  ;;  %v1893_v15 = vpack.c.bf16 %v656_v9, %v655_v8  ;;  %v625_v16 = vld [vmem:[%s2413_s28 + $0x190] sm:$0xff]  ;;  %v370_v8 = vld [vmem:[%s2206_s3 + $0x2a0] sm:$0xff]  ;;  %v521_v9 = vld [vmem:[%s2206_s3 + $0x758] sm:$0xff] }
  0x9d   : > { %1828 = vmatpush1.bf16.msra.mxu1 %v1827_v17  ;;  %1876 = vmatpush1.bf16.msra.mxu0 %v1875_v18  ;;  %v626_v17 = vld [vmem:[%s2413_s28 + $0x198] sm:$0xff]  ;;  %v657_v18 = vld [vmem:[%s2413_s28 + $0x290] sm:$0xff] }
  0x9e   : > { %1829 = vmatprep.subr.bf16.mxu1 %v2097_v3  ;;  %1877 = vmatprep.subr.bf16.mxu0 %v2097_v3 }
  0x9f   : > { %871 = vmatmul.mubr.f32.gmra.mrb[6].mxu1 %v448_v23  ;;  %751 = vmatmul.mubr.f32.gmra.mrb[6].mxu0 %v304_v24  ;;  %v347_v23 = vld [vmem:[%s2206_s3 + $0x1e8] sm:$0xff]  ;;  %v1848_v24 = vpack.c.bf16 %v626_v17, %v625_v16  ;;  %v670_v16 = vld [vmem:[%s2413_s28 + $0x2f8] sm:$0xff]  ;;  %v520_v17 = vld [vmem:[%s2206_s3 + $0x750] sm:$0xff] }
  0xa0   : > { %875 = vmatprep.mubr.f32.mxu1 %v455_v25  ;;  %755 = vmatprep.mubr.f32.mxu0 %v311_v26  ;;  %v1896_v25 = vpack.c.bf16 %v658_v19, %v657_v18  ;;  %v627_v26 = vld [vmem:[%s2413_s28 + $0x1a0] sm:$0xff]  ;;  %v376_v18 = vld [vmem:[%s2206_s3 + $0x2d0] sm:$0xff]  ;;  %v527_v19 = vld [vmem:[%s2206_s3 + $0x788] sm:$0xff] }
  0xa1   : > { %1831 = vmatpush1.bf16.msra.mxu1 %v1830_v27  ;;  %1879 = vmatpush1.bf16.msra.mxu0 %v1878_v28  ;;  %v628_v27 = vld [vmem:[%s2413_s28 + $0x1a8] sm:$0xff]  ;;  %v659_v28 = vld [vmem:[%s2413_s28 + $0x2a0] sm:$0xff] }
  0xa2   : > { %1832 = vmatprep.subr.bf16.mxu1 %v2097_v3  ;;  %1880 = vmatprep.subr.bf16.mxu0 %v2097_v3 }
  0xa3   : > { %876 = vmatmul.mubr.f32.gmra.mrb[8].mxu1 %v454_v33  ;;  %756 = vmatmul.mubr.f32.gmra.mrb[8].mxu0 %v310_v34  ;;  %v353_v33 = vld [vmem:[%s2206_s3 + $0x218] sm:$0xff]  ;;  %v1851_v34 = vpack.c.bf16 %v628_v27, %v627_v26  ;;  %v388_v27 = vld [vmem:[%s2206_s3 + $0x330] sm:$0xff] }
  0xa4   : > { %880 = vmatprep.mubr.f32.mxu1 %v461_v35  ;;  %760 = vmatprep.mubr.f32.mxu0 %v317_v36  ;;  %v1899_v35 = vpack.c.bf16 %v660_v29, %v659_v28  ;;  %v629_v36 = vld [vmem:[%s2413_s28 + $0x1b0] sm:$0xff]  ;;  %v389_v26 = vld [vmem:[%s2206_s3 + $0x338] sm:$0xff]  ;;  %v539_v28 = vld [vmem:[%s2206_s3 + $0x7e8] sm:$0xff] }
  0xa5   : > { %1834 = vmatpush1.bf16.msra.mxu1 %v1833_v37  ;;  %1882 = vmatpush1.bf16.msra.mxu0 %v1881_v38  ;;  %v630_v37 = vld [vmem:[%s2413_s28 + $0x1b8] sm:$0xff]  ;;  %v661_v38 = vld [vmem:[%s2413_s28 + $0x2b0] sm:$0xff]  ;;  %v395_v29 = vld [vmem:[%s2206_s3 + $0x368] sm:$0xff] }
  0xa6   : > { %1835 = vmatprep.subr.bf16.mxu1 %v2097_v3  ;;  %1883 = vmatprep.subr.bf16.mxu0 %v2097_v3 }
  0xa7   : > { %881 = vmatmul.mubr.f32.gmra.mrb[10].mxu1 %v460_v43  ;;  %761 = vmatmul.mubr.f32.gmra.mrb[10].mxu0 %v316_v44  ;;  %v359_v43 = vld [vmem:[%s2206_s3 + $0x248] sm:$0xff]  ;;  %v1854_v44 = vpack.c.bf16 %v630_v37, %v629_v36 }
  0xa8   : > { %885 = vmatprep.mubr.f32.mxu1 %v467_v45  ;;  %765 = vmatprep.mubr.f32.mxu0 %v323_v46  ;;  %v1902_v45 = vpack.c.bf16 %v662_v39, %v661_v38  ;;  %v631_v46 = vld [vmem:[%s2413_s28 + $0x1c0] sm:$0xff]  ;;  %v551_v36 = vld [vmem:[%s2206_s3 + $0x848] sm:$0xff] }
  0xa9   : > { %1837 = vmatpush1.bf16.msra.mxu1 %v1836_v47  ;;  %1885 = vmatpush1.bf16.msra.mxu0 %v1884_v48  ;;  %v632_v47 = vld [vmem:[%s2413_s28 + $0x1c8] sm:$0xff]  ;;  %v663_v48 = vld [vmem:[%s2413_s28 + $0x2c0] sm:$0xff] }
  0xaa   : > { %1838 = vmatprep.subr.bf16.mxu1 %v2097_v3  ;;  %1886 = vmatprep.subr.bf16.mxu0 %v2097_v3  ;;  %v407_v37 = vld [vmem:[%s2206_s3 + $0x3c8] sm:$0xff]  ;;  %v550_v38 = vld [vmem:[%s2206_s3 + $0x840] sm:$0xff] }
  0xab   : > { %886 = vmatmul.mubr.f32.gmra.mrb[12].mxu1 %v466_v53  ;;  %766 = vmatmul.mubr.f32.gmra.mrb[12].mxu0 %v322_v54  ;;  %v365_v53 = vld [vmem:[%s2206_s3 + $0x278] sm:$0xff]  ;;  %v1857_v54 = vpack.c.bf16 %v632_v47, %v631_v46  ;;  %v406_v39 = vld [vmem:[%s2206_s3 + $0x3c0] sm:$0xff] }
  0xac   : > { %890 = vmatprep.mubr.f32.mxu1 %v473_v55  ;;  %770 = vmatprep.mubr.f32.mxu0 %v329_v56  ;;  %v1905_v55 = vpack.c.bf16 %v664_v49, %v663_v48  ;;  %v633_v56 = vld [vmem:[%s2413_s28 + $0x1d0] sm:$0xff]  ;;  %v562_v46 = vld [vmem:[%s2206_s3 + $0x8a0] sm:$0xff]  ;;  %v569_v48 = vld [vmem:[%s2206_s3 + $0x8d8] sm:$0xff] }
  0xad   : > { %1840 = vmatpush1.bf16.msra.mxu1 %v1839_v57  ;;  %1888 = vmatpush1.bf16.msra.mxu0 %v1887_v58  ;;  %v634_v57 = vld [vmem:[%s2413_s28 + $0x1d8] sm:$0xff]  ;;  %v665_v58 = vld [vmem:[%s2413_s28 + $0x2d0] sm:$0xff]  ;;  %v418_v47 = vld [vmem:[%s2206_s3 + $0x420] sm:$0xff] }
  0xae   : > { %1841 = vmatprep.subr.bf16.mxu1 %v2097_v3  ;;  %1889 = vmatprep.subr.bf16.mxu0 %v2097_v3  ;;  %v425_v49 = vld [vmem:[%s2206_s3 + $0x458] sm:$0xff] }
  0xaf   : > { %891 = vmatmul.mubr.f32.gmra.mrb[14].mxu1 %v472_v63  ;;  %771 = vmatmul.mubr.f32.gmra.mrb[14].mxu0 %v328_v0  ;;  %v371_v63 = vld [vmem:[%s2206_s3 + $0x2a8] sm:$0xff]  ;;  %v1860_v0 = vpack.c.bf16 %v634_v57, %v633_v56  ;;  %v297_v57 = vld [vmem:[%s2206_s3 + $0x58] sm:$0xff] }
  0xb0   : > { %895 = vmatprep.mubr.f32.mxu1 %v479_v1  ;;  %775 = vmatprep.mubr.f32.mxu0 %v335_v2  ;;  %v1908_v1 = vpack.c.bf16 %v666_v59, %v665_v58  ;;  %v635_v2 = vld [vmem:[%s2413_s28 + $0x1e0] sm:$0xff]  ;;  %v295_v56 = vld [vmem:[%s2206_s3 + $0x48] sm:$0xff]  ;;  %v296_v59 = vld [vmem:[%s2206_s3 + $0x50] sm:$0xff] }
  0xb1   : > { %1843 = vmatpush1.bf16.msra.mxu1 %v1842_v4  ;;  %1891 = vmatpush1.bf16.msra.mxu0 %v1890_v5  ;;  %v636_v4 = vld [vmem:[%s2413_s28 + $0x1e8] sm:$0xff]  ;;  %v667_v5 = vld [vmem:[%s2413_s28 + $0x2e0] sm:$0xff] }
  0xb2   : > { %1844 = vmatprep.subr.bf16.mxu1 %v2097_v3  ;;  %1892 = vmatprep.subr.bf16.mxu0 %v2097_v3  ;;  %v294_v58 = vld [vmem:[%s2206_s3 + $0x40] sm:$0xff] }
  0xb3   : > { %896 = vmatmul.mubr.f32.gmra.mrb[16].mxu1 %v478_v10  ;;  %776 = vmatmul.mubr.f32.gmra.mrb[16].mxu0 %v334_v11  ;;  %v377_v10 = vld [vmem:[%s2206_s3 + $0x2d8] sm:$0xff]  ;;  %v1863_v11 = vpack.c.bf16 %v636_v4, %v635_v2  ;;  %v306_v2 = vld [vmem:[%s2206_s3 + $0xa0] sm:$0xff]  ;;  %v308_v4 = vld [vmem:[%s2206_s3 + $0xb0] sm:$0xff] }
  0xb4   : > { %900 = vmatprep.mubr.f32.mxu1 %v485_v12  ;;  %780 = vmatprep.mubr.f32.mxu0 %v341_v13  ;;  %v1911_v12 = vpack.c.bf16 %v668_v6, %v667_v5  ;;  %v637_v13 = vld [vmem:[%s2413_s28 + $0x1f0] sm:$0xff]  ;;  %v313_v5 = vld [vmem:[%s2206_s3 + $0xd8] sm:$0xff]  ;;  %v315_v6 = vld [vmem:[%s2206_s3 + $0xe8] sm:$0xff] }
  0xb5   : > { %1846 = vmatpush1.bf16.msra.mxu1 %v1845_v14  ;;  %1894 = vmatpush1.bf16.msra.mxu0 %v1893_v15  ;;  %v638_v14 = vld [vmem:[%s2413_s28 + $0x1f8] sm:$0xff]  ;;  %v669_v15 = vld [vmem:[%s2413_s28 + $0x2f0] sm:$0xff] }
  0xb6   : > { %1847 = vmatprep.subr.bf16.mxu1 %v2097_v3  ;;  %1895 = vmatprep.subr.bf16.mxu0 %v2097_v3 }
  0xb7   : > { %901 = vmatmul.mubr.f32.gmra.mrb[18].mxu1 %v484_v20  ;;  %781 = vmatmul.mubr.f32.gmra.mrb[18].mxu0 %v340_v21  ;;  %v383_v20 = vld [vmem:[%s2206_s3 + $0x308] sm:$0xff]  ;;  %v1866_v21 = vpack.c.bf16 %v638_v14, %v637_v13  ;;  %v325_v13 = vld [vmem:[%s2206_s3 + $0x138] sm:$0xff] }
  0xb8   : > { %905 = vmatprep.mubr.f32.mxu1 %v491_v22  ;;  %785 = vmatprep.mubr.f32.mxu0 %v347_v23  ;;  %v1914_v22 = vpack.c.bf16 %v670_v16, %v669_v15  ;;  %v526_v23 = vld [vmem:[%s2206_s3 + $0x780] sm:$0xff]  ;;  %v327_v14 = vld [vmem:[%s2206_s3 + $0x148] sm:$0xff]  ;;  %v324_v15 = vld [vmem:[%s2206_s3 + $0x130] sm:$0xff] }
  0xb9   : > { %1849 = vmatpush1.bf16.msra.mxu1 %v1848_v24  ;;  %1897 = vmatpush1.bf16.msra.mxu0 %v1896_v25  ;;  %v382_v24 = vld [vmem:[%s2206_s3 + $0x300] sm:$0xff]  ;;  %v533_v25 = vld [vmem:[%s2206_s3 + $0x7b8] sm:$0xff] }
  0xba   : > { %1850 = vmatprep.subr.bf16.mxu1 %v2097_v3  ;;  %1898 = vmatprep.subr.bf16.mxu0 %v2097_v3  ;;  %v326_v16 = vld [vmem:[%s2206_s3 + $0x140] sm:$0xff] }
  0xbb   : > { %906 = vmatmul.mubr.f32.gmra.mrb[20].mxu1 %v490_v30  ;;  %786 = vmatmul.mubr.f32.gmra.mrb[20].mxu0 %v346_v31  ;;  %v538_v30 = vld [vmem:[%s2206_s3 + $0x7e0] sm:$0xff] }
  0xbc   : > { %910 = vmatprep.mubr.f32.mxu1 %v497_v32  ;;  %790 = vmatprep.mubr.f32.mxu0 %v353_v33  ;;  %v394_v31 = vld [vmem:[%s2206_s3 + $0x360] sm:$0xff]  ;;  %v545_v32 = vld [vmem:[%s2206_s3 + $0x818] sm:$0xff] }
  0xbd   : > { %1852 = vmatpush1.bf16.msra.mxu1 %v1851_v34  ;;  %1900 = vmatpush1.bf16.msra.mxu0 %v1899_v35  ;;  %v401_v33 = vld [vmem:[%s2206_s3 + $0x398] sm:$0xff]  ;;  %v544_v34 = vld [vmem:[%s2206_s3 + $0x810] sm:$0xff] }
  0xbe   : > { %1853 = vmatprep.subr.bf16.mxu1 %v2097_v3  ;;  %1901 = vmatprep.subr.bf16.mxu0 %v2097_v3  ;;  %v400_v35 = vld [vmem:[%s2206_s3 + $0x390] sm:$0xff] }
  0xbf   : > { %911 = vmatmul.mubr.f32.gmra.mrb[22].mxu1 %v496_v40  ;;  %791 = vmatmul.mubr.f32.gmra.mrb[22].mxu0 %v352_v41  ;;  %v557_v40 = vld [vmem:[%s2206_s3 + $0x878] sm:$0xff] }
  0xc0   : > { %915 = vmatprep.mubr.f32.mxu1 %v503_v42  ;;  %795 = vmatprep.mubr.f32.mxu0 %v359_v43  ;;  %v413_v41 = vld [vmem:[%s2206_s3 + $0x3f8] sm:$0xff]  ;;  %v556_v42 = vld [vmem:[%s2206_s3 + $0x870] sm:$0xff] }
  0xc1   : > { %1855 = vmatpush1.bf16.msra.mxu1 %v1854_v44  ;;  %1903 = vmatpush1.bf16.msra.mxu0 %v1902_v45  ;;  %v412_v43 = vld [vmem:[%s2206_s3 + $0x3f0] sm:$0xff]  ;;  %v563_v44 = vld [vmem:[%s2206_s3 + $0x8a8] sm:$0xff] }
  0xc2   : > { %1856 = vmatprep.subr.bf16.mxu1 %v2097_v3  ;;  %1904 = vmatprep.subr.bf16.mxu0 %v2097_v3  ;;  %v419_v45 = vld [vmem:[%s2206_s3 + $0x428] sm:$0xff] }
  0xc3   : > { %916 = vmatmul.mubr.f32.gmra.mrb[24].mxu1 %v502_v50  ;;  %796 = vmatmul.mubr.f32.gmra.mrb[24].mxu0 %v358_v51  ;;  %v568_v50 = vld [vmem:[%s2206_s3 + $0x8d0] sm:$0xff] }
  0xc4   : > { %920 = vmatprep.mubr.f32.mxu1 %v509_v52  ;;  %800 = vmatprep.mubr.f32.mxu0 %v365_v53  ;;  %v424_v51 = vld [vmem:[%s2206_s3 + $0x450] sm:$0xff]  ;;  %v289_v52 = vld [vmem:[%s2206_s3 + $0x18] sm:$0xff]  ;;  %v291_v53 = vld [vmem:[%s2206_s3 + $0x28] sm:$0xff] }
  0xc5   : > { %1858 = vmatpush1.bf16.msra.mxu1 %v1857_v54  ;;  %1906 = vmatpush1.bf16.msra.mxu0 %v1905_v55  ;;  %v288_v54 = vld [vmem:[%s2206_s3 + $0x10] sm:$0xff]  ;;  %v290_v55 = vld [vmem:[%s2206_s3 + $0x20] sm:$0xff] }
  0xc6   : > { %1859 = vmatprep.subr.bf16.mxu1 %v2097_v3  ;;  %1907 = vmatprep.subr.bf16.mxu0 %v2097_v3 }
  0xc7   : > { %921 = vmatmul.mubr.f32.gmra.mrb[26].mxu1 %v508_v60  ;;  %801 = vmatmul.mubr.f32.gmra.mrb[26].mxu0 %v364_v61  ;;  %v301_v60 = vld [vmem:[%s2206_s3 + $0x78] sm:$0xff]  ;;  %v303_v61 = vld [vmem:[%s2206_s3 + $0x88] sm:$0xff] }
  0xc8   : > { %925 = vmatprep.mubr.f32.mxu1 %v515_v62  ;;  %805 = vmatprep.mubr.f32.mxu0 %v371_v63  ;;  %v300_v62 = vld [vmem:[%s2206_s3 + $0x70] sm:$0xff]  ;;  %v302_v63 = vld [vmem:[%s2206_s3 + $0x80] sm:$0xff] }
  0xc9   : > { %1861 = vmatpush1.bf16.msra.mxu1 %v1860_v0  ;;  %1909 = vmatpush1.bf16.msra.mxu0 %v1908_v1  ;;  %v307_v0 = vld [vmem:[%s2206_s3 + $0xa8] sm:$0xff]  ;;  %v309_v1 = vld [vmem:[%s2206_s3 + $0xb8] sm:$0xff] }
  0xca   : > { %1862 = vmatprep.subr.bf16.mxu1 %v2097_v3  ;;  %1910 = vmatprep.subr.bf16.mxu0 %v2097_v3 }
  0xcb   : > { %926 = vmatmul.mubr.f32.gmra.mrb[28].mxu1 %v514_v7  ;;  %806 = vmatmul.mubr.f32.gmra.mrb[28].mxu0 %v370_v8  ;;  %v312_v7 = vld [vmem:[%s2206_s3 + $0xd0] sm:$0xff]  ;;  %v314_v8 = vld [vmem:[%s2206_s3 + $0xe0] sm:$0xff] }
  0xcc   : > { %930 = vmatprep.mubr.f32.mxu1 %v521_v9  ;;  %810 = vmatprep.mubr.f32.mxu0 %v377_v10  ;;  %v319_v9 = vld [vmem:[%s2206_s3 + $0x108] sm:$0xff]  ;;  %v321_v10 = vld [vmem:[%s2206_s3 + $0x118] sm:$0xff] }
  0xcd   : > { %1864 = vmatpush1.bf16.msra.mxu1 %v1863_v11  ;;  %1912 = vmatpush1.bf16.msra.mxu0 %v1911_v12  ;;  %v318_v11 = vld [vmem:[%s2206_s3 + $0x100] sm:$0xff]  ;;  %v320_v12 = vld [vmem:[%s2206_s3 + $0x110] sm:$0xff] }
  0xce   : > { %1865 = vmatprep.subr.bf16.mxu1 %v2097_v3  ;;  %1913 = vmatprep.subr.bf16.mxu0 %v2097_v3  ;;  %v532_v3 = vld [vmem:[%s2206_s3 + $0x7b0] sm:$0xff] }
  0xcf   : > { %931 = vmatmul.mubr.f32.gmra.mrb[30].mxu1 %v520_v17  ;;  %811 = vmatmul.mubr.f32.gmra.mrb[30].mxu0 %v376_v18  ;;  %v331_v17 = vld [vmem:[%s2206_s3 + $0x168] sm:$0xff]  ;;  %v333_v18 = vld [vmem:[%s2206_s3 + $0x178] sm:$0xff] }
  0xd0   : > { %935 = vmatprep.mubr.f32.mxu1 %v527_v19  ;;  %815 = vmatprep.mubr.f32.mxu0 %v383_v20  ;;  %v330_v19 = vld [vmem:[%s2206_s3 + $0x160] sm:$0xff]  ;;  %v332_v20 = vld [vmem:[%s2206_s3 + $0x170] sm:$0xff] }
  0xd1   : > { %1867 = vmatpush1.bf16.msra.mxu1 %v1866_v21  ;;  %1915 = vmatpush1.bf16.msra.mxu0 %v1914_v22  ;;  %v337_v21 = vld [vmem:[%s2206_s3 + $0x198] sm:$0xff]  ;;  %v339_v22 = vld [vmem:[%s2206_s3 + $0x1a8] sm:$0xff] }
  0xd3   : > { %936 = vmatmul.mubr.f32.gmra.mrb[32].mxu1 %v526_v23  ;;  %816 = vmatmul.mubr.f32.gmra.mrb[32].mxu0 %v382_v24  ;;  %v336_v23 = vld [vmem:[%s2206_s3 + $0x190] sm:$0xff]  ;;  %v338_v24 = vld [vmem:[%s2206_s3 + $0x1a0] sm:$0xff] }
  0xd4   : > { %940 = vmatprep.mubr.f32.mxu1 %v533_v25  ;;  %820 = vmatprep.mubr.f32.mxu0 %v389_v26  ;;  %v343_v25 = vld [vmem:[%s2206_s3 + $0x1c8] sm:$0xff]  ;;  %v345_v26 = vld [vmem:[%s2206_s3 + $0x1d8] sm:$0xff] }
  0xd7   : > { %941 = vmatmul.mubr.f32.gmra.mrb[34].mxu1 %v532_v3  ;;  %821 = vmatmul.mubr.f32.gmra.mrb[34].mxu0 %v388_v27  ;;  %v342_v3 = vld [vmem:[%s2206_s3 + $0x1c0] sm:$0xff]  ;;  %v344_v27 = vld [vmem:[%s2206_s3 + $0x1d0] sm:$0xff] }
  0xd8   : > { %945 = vmatprep.mubr.f32.mxu1 %v539_v28  ;;  %825 = vmatprep.mubr.f32.mxu0 %v395_v29  ;;  %v349_v28 = vld [vmem:[%s2206_s3 + $0x1f8] sm:$0xff]  ;;  %v351_v29 = vld [vmem:[%s2206_s3 + $0x208] sm:$0xff] }
  0xdb   : > { %946 = vmatmul.mubr.f32.gmra.mrb[36].mxu1 %v538_v30  ;;  %826 = vmatmul.mubr.f32.gmra.mrb[36].mxu0 %v394_v31  ;;  %v348_v30 = vld [vmem:[%s2206_s3 + $0x1f0] sm:$0xff]  ;;  %v350_v31 = vld [vmem:[%s2206_s3 + $0x200] sm:$0xff] }
  0xdc   : > { %950 = vmatprep.mubr.f32.mxu1 %v545_v32  ;;  %830 = vmatprep.mubr.f32.mxu0 %v401_v33  ;;  %v355_v32 = vld [vmem:[%s2206_s3 + $0x228] sm:$0xff]  ;;  %v357_v33 = vld [vmem:[%s2206_s3 + $0x238] sm:$0xff] }
  0xdf   : > { %951 = vmatmul.mubr.f32.gmra.mrb[38].mxu1 %v544_v34  ;;  %831 = vmatmul.mubr.f32.gmra.mrb[38].mxu0 %v400_v35  ;;  %v354_v34 = vld [vmem:[%s2206_s3 + $0x220] sm:$0xff]  ;;  %v356_v35 = vld [vmem:[%s2206_s3 + $0x230] sm:$0xff] }
  0xe0   : > { %955 = vmatprep.mubr.f32.mxu1 %v551_v36  ;;  %835 = vmatprep.mubr.f32.mxu0 %v407_v37  ;;  %v361_v36 = vld [vmem:[%s2206_s3 + $0x258] sm:$0xff]  ;;  %v363_v37 = vld [vmem:[%s2206_s3 + $0x268] sm:$0xff] }
  0xe3   : > { %956 = vmatmul.mubr.f32.gmra.mrb[40].mxu1 %v550_v38  ;;  %836 = vmatmul.mubr.f32.gmra.mrb[40].mxu0 %v406_v39  ;;  %v360_v38 = vld [vmem:[%s2206_s3 + $0x250] sm:$0xff]  ;;  %v362_v39 = vld [vmem:[%s2206_s3 + $0x260] sm:$0xff] }
  0xe4   : > { %960 = vmatprep.mubr.f32.mxu1 %v557_v40  ;;  %840 = vmatprep.mubr.f32.mxu0 %v413_v41  ;;  %v367_v40 = vld [vmem:[%s2206_s3 + $0x288] sm:$0xff]  ;;  %v369_v41 = vld [vmem:[%s2206_s3 + $0x298] sm:$0xff] }
  0xe7   : > { %961 = vmatmul.mubr.f32.gmra.mrb[42].mxu1 %v556_v42  ;;  %841 = vmatmul.mubr.f32.gmra.mrb[42].mxu0 %v412_v43  ;;  %v366_v42 = vld [vmem:[%s2206_s3 + $0x280] sm:$0xff]  ;;  %v368_v43 = vld [vmem:[%s2206_s3 + $0x290] sm:$0xff] }
  0xe8   : > { %965 = vmatprep.mubr.f32.mxu1 %v563_v44  ;;  %845 = vmatprep.mubr.f32.mxu0 %v419_v45  ;;  %v373_v44 = vld [vmem:[%s2206_s3 + $0x2b8] sm:$0xff]  ;;  %v375_v45 = vld [vmem:[%s2206_s3 + $0x2c8] sm:$0xff] }
  0xeb   : > { %966 = vmatmul.mubr.f32.gmra.mrb[44].mxu1 %v562_v46  ;;  %846 = vmatmul.mubr.f32.gmra.mrb[44].mxu0 %v418_v47  ;;  %v372_v46 = vld [vmem:[%s2206_s3 + $0x2b0] sm:$0xff]  ;;  %v374_v47 = vld [vmem:[%s2206_s3 + $0x2c0] sm:$0xff] }
  0xec   : > { %970 = vmatprep.mubr.f32.mxu1 %v569_v48  ;;  %850 = vmatprep.mubr.f32.mxu0 %v425_v49  ;;  %v379_v48 = vld [vmem:[%s2206_s3 + $0x2e8] sm:$0xff]  ;;  %v381_v49 = vld [vmem:[%s2206_s3 + $0x2f8] sm:$0xff] }
  0xef   : > { %971 = vmatmul.mubr.f32.gmra.mrb[46].mxu1 %v568_v50  ;;  %851 = vmatmul.mubr.f32.gmra.mrb[46].mxu0 %v424_v51  ;;  %v378_v50 = vld [vmem:[%s2206_s3 + $0x2e0] sm:$0xff]  ;;  %v380_v51 = vld [vmem:[%s2206_s3 + $0x2f0] sm:$0xff] }
  0xf0   : > { %1040 = vmatprep.mubr.f32.mxu1 %v289_v52  ;;  %1345 = vmatprep.mubr.f32.mxu0 %v291_v53  ;;  %v385_v52 = vld [vmem:[%s2206_s3 + $0x318] sm:$0xff]  ;;  %v387_v53 = vld [vmem:[%s2206_s3 + $0x328] sm:$0xff] }
  0xf3   : > { %1041 = vmatmul.mubr.f32.vlgmr.msra.gmra.mrb[48].mxu1 %v288_v54  ;;  %1346 = vmatmul.mubr.f32.vlgmr.msra.gmra.mrb[48].mxu0 %v290_v55  ;;  %v384_v54 = vld [vmem:[%s2206_s3 + $0x310] sm:$0xff]  ;;  %v386_v55 = vld [vmem:[%s2206_s3 + $0x320] sm:$0xff] }
  0xf4   : > { %1045 = vmatprep.mubr.f32.mxu1 %v295_v56  ;;  %1350 = vmatprep.mubr.f32.mxu0 %v297_v57  ;;  %v391_v56 = vld [vmem:[%s2206_s3 + $0x348] sm:$0xff]  ;;  %v393_v57 = vld [vmem:[%s2206_s3 + $0x358] sm:$0xff] }
  0xf7   : > { %1046 = vmatmul.mubr.f32.gmra.mrb[50].mxu1 %v294_v58  ;;  %1351 = vmatmul.mubr.f32.gmra.mrb[50].mxu0 %v296_v59  ;;  %v390_v58 = vld [vmem:[%s2206_s3 + $0x340] sm:$0xff]  ;;  %v392_v59 = vld [vmem:[%s2206_s3 + $0x350] sm:$0xff] }
  0xf8   : > { %1050 = vmatprep.mubr.f32.mxu1 %v301_v60  ;;  %1355 = vmatprep.mubr.f32.mxu0 %v303_v61  ;;  %v397_v60 = vld [vmem:[%s2206_s3 + $0x378] sm:$0xff]  ;;  %v399_v61 = vld [vmem:[%s2206_s3 + $0x388] sm:$0xff] }
  0xfb   : > { %1051 = vmatmul.mubr.f32.gmra.mrb[52].mxu1 %v300_v62  ;;  %1356 = vmatmul.mubr.f32.gmra.mrb[52].mxu0 %v302_v63  ;;  %v396_v62 = vld [vmem:[%s2206_s3 + $0x370] sm:$0xff]  ;;  %v398_v63 = vld [vmem:[%s2206_s3 + $0x380] sm:$0xff] }
  0xfc   : > { %1055 = vmatprep.mubr.f32.mxu1 %v307_v0  ;;  %1360 = vmatprep.mubr.f32.mxu0 %v309_v1  ;;  %v403_v0 = vld [vmem:[%s2206_s3 + $0x3a8] sm:$0xff]  ;;  %v405_v1 = vld [vmem:[%s2206_s3 + $0x3b8] sm:$0xff] }
  0xff   : > { %1056 = vmatmul.mubr.f32.gmra.mrb[54].mxu1 %v306_v2  ;;  %1361 = vmatmul.mubr.f32.gmra.mrb[54].mxu0 %v308_v4  ;;  %v402_v2 = vld [vmem:[%s2206_s3 + $0x3a0] sm:$0xff]  ;;  %v404_v4 = vld [vmem:[%s2206_s3 + $0x3b0] sm:$0xff] }
 0x100   : > { %1060 = vmatprep.mubr.f32.mxu1 %v313_v5  ;;  %1365 = vmatprep.mubr.f32.mxu0 %v315_v6  ;;  %v409_v5 = vld [vmem:[%s2206_s3 + $0x3d8] sm:$0xff]  ;;  %v411_v6 = vld [vmem:[%s2206_s3 + $0x3e8] sm:$0xff] }
 0x103   : > { %1061 = vmatmul.mubr.f32.gmra.mrb[56].mxu1 %v312_v7  ;;  %1366 = vmatmul.mubr.f32.gmra.mrb[56].mxu0 %v314_v8  ;;  %v408_v7 = vld [vmem:[%s2206_s3 + $0x3d0] sm:$0xff]  ;;  %v410_v8 = vld [vmem:[%s2206_s3 + $0x3e0] sm:$0xff] }
 0x104   : > { %1065 = vmatprep.mubr.f32.mxu1 %v319_v9  ;;  %1370 = vmatprep.mubr.f32.mxu0 %v321_v10  ;;  %v415_v9 = vld [vmem:[%s2206_s3 + $0x408] sm:$0xff]  ;;  %v417_v10 = vld [vmem:[%s2206_s3 + $0x418] sm:$0xff] }
 0x107   : > { %1066 = vmatmul.mubr.f32.gmra.mrb[58].mxu1 %v318_v11  ;;  %1371 = vmatmul.mubr.f32.gmra.mrb[58].mxu0 %v320_v12  ;;  %v414_v11 = vld [vmem:[%s2206_s3 + $0x400] sm:$0xff]  ;;  %v416_v12 = vld [vmem:[%s2206_s3 + $0x410] sm:$0xff] }
 0x108   : > { %1070 = vmatprep.mubr.f32.mxu1 %v325_v13  ;;  %1375 = vmatprep.mubr.f32.mxu0 %v327_v14  ;;  %v421_v13 = vld [vmem:[%s2206_s3 + $0x438] sm:$0xff]  ;;  %v423_v14 = vld [vmem:[%s2206_s3 + $0x448] sm:$0xff] }
 0x10b   : > { %1071 = vmatmul.mubr.f32.gmra.mrb[60].mxu1 %v324_v15  ;;  %1376 = vmatmul.mubr.f32.gmra.mrb[60].mxu0 %v326_v16  ;;  %v420_v15 = vld [vmem:[%s2206_s3 + $0x430] sm:$0xff]  ;;  %v422_v16 = vld [vmem:[%s2206_s3 + $0x440] sm:$0xff] }
 0x10c   : > { %1075 = vmatprep.mubr.f32.mxu1 %v331_v17  ;;  %1380 = vmatprep.mubr.f32.mxu0 %v333_v18  ;;  %v427_v17 = vld [vmem:[%s2206_s3 + $0x468] sm:$0xff]  ;;  %v429_v18 = vld [vmem:[%s2206_s3 + $0x478] sm:$0xff] }
 0x10f   : > { %1076 = vmatmul.mubr.f32.gmra.mrb[62].mxu1 %v330_v19  ;;  %1381 = vmatmul.mubr.f32.gmra.mrb[62].mxu0 %v332_v20  ;;  %v426_v19 = vld [vmem:[%s2206_s3 + $0x460] sm:$0xff]  ;;  %v428_v20 = vld [vmem:[%s2206_s3 + $0x470] sm:$0xff] }
 0x110   : > { %1080 = vmatprep.mubr.f32.mxu1 %v337_v21  ;;  %1385 = vmatprep.mubr.f32.mxu0 %v339_v22  ;;  %v433_v21 = vld [vmem:[%s2206_s3 + $0x498] sm:$0xff]  ;;  %v435_v22 = vld [vmem:[%s2206_s3 + $0x4a8] sm:$0xff] }
 0x113   : > { %1081 = vmatmul.mubr.f32.gmra.mrb[64].mxu1 %v336_v23  ;;  %1386 = vmatmul.mubr.f32.gmra.mrb[64].mxu0 %v338_v24  ;;  %v432_v23 = vld [vmem:[%s2206_s3 + $0x490] sm:$0xff]  ;;  %v434_v24 = vld [vmem:[%s2206_s3 + $0x4a0] sm:$0xff] }
 0x114   : > { %1085 = vmatprep.mubr.f32.mxu1 %v343_v25  ;;  %1390 = vmatprep.mubr.f32.mxu0 %v345_v26  ;;  %v439_v25 = vld [vmem:[%s2206_s3 + $0x4c8] sm:$0xff]  ;;  %v441_v26 = vld [vmem:[%s2206_s3 + $0x4d8] sm:$0xff] }
 0x117   : > { %1086 = vmatmul.mubr.f32.gmra.mrb[66].mxu1 %v342_v3  ;;  %1391 = vmatmul.mubr.f32.gmra.mrb[66].mxu0 %v344_v27  ;;  %v438_v3 = vld [vmem:[%s2206_s3 + $0x4c0] sm:$0xff]  ;;  %v440_v27 = vld [vmem:[%s2206_s3 + $0x4d0] sm:$0xff] }
 0x118   : > { %1090 = vmatprep.mubr.f32.mxu1 %v349_v28  ;;  %1395 = vmatprep.mubr.f32.mxu0 %v351_v29  ;;  %v445_v28 = vld [vmem:[%s2206_s3 + $0x4f8] sm:$0xff]  ;;  %v447_v29 = vld [vmem:[%s2206_s3 + $0x508] sm:$0xff] }
 0x11b   : > { %1091 = vmatmul.mubr.f32.gmra.mrb[68].mxu1 %v348_v30  ;;  %1396 = vmatmul.mubr.f32.gmra.mrb[68].mxu0 %v350_v31  ;;  %v444_v30 = vld [vmem:[%s2206_s3 + $0x4f0] sm:$0xff]  ;;  %v446_v31 = vld [vmem:[%s2206_s3 + $0x500] sm:$0xff] }
 0x11c   : > { %1095 = vmatprep.mubr.f32.mxu1 %v355_v32  ;;  %1400 = vmatprep.mubr.f32.mxu0 %v357_v33  ;;  %v451_v32 = vld [vmem:[%s2206_s3 + $0x528] sm:$0xff]  ;;  %v453_v33 = vld [vmem:[%s2206_s3 + $0x538] sm:$0xff] }
 0x11f   : > { %1096 = vmatmul.mubr.f32.gmra.mrb[70].mxu1 %v354_v34  ;;  %1401 = vmatmul.mubr.f32.gmra.mrb[70].mxu0 %v356_v35  ;;  %v450_v34 = vld [vmem:[%s2206_s3 + $0x520] sm:$0xff]  ;;  %v452_v35 = vld [vmem:[%s2206_s3 + $0x530] sm:$0xff] }
 0x120   : > { %1100 = vmatprep.mubr.f32.mxu1 %v361_v36  ;;  %1405 = vmatprep.mubr.f32.mxu0 %v363_v37  ;;  %v457_v36 = vld [vmem:[%s2206_s3 + $0x558] sm:$0xff]  ;;  %v459_v37 = vld [vmem:[%s2206_s3 + $0x568] sm:$0xff] }
 0x123   : > { %1101 = vmatmul.mubr.f32.gmra.mrb[72].mxu1 %v360_v38  ;;  %1406 = vmatmul.mubr.f32.gmra.mrb[72].mxu0 %v362_v39  ;;  %v456_v38 = vld [vmem:[%s2206_s3 + $0x550] sm:$0xff]  ;;  %v458_v39 = vld [vmem:[%s2206_s3 + $0x560] sm:$0xff] }
 0x124   : > { %1105 = vmatprep.mubr.f32.mxu1 %v367_v40  ;;  %1410 = vmatprep.mubr.f32.mxu0 %v369_v41  ;;  %v463_v40 = vld [vmem:[%s2206_s3 + $0x588] sm:$0xff]  ;;  %v465_v41 = vld [vmem:[%s2206_s3 + $0x598] sm:$0xff] }
 0x127   : > { %1106 = vmatmul.mubr.f32.gmra.mrb[74].mxu1 %v366_v42  ;;  %1411 = vmatmul.mubr.f32.gmra.mrb[74].mxu0 %v368_v43  ;;  %v462_v42 = vld [vmem:[%s2206_s3 + $0x580] sm:$0xff]  ;;  %v464_v43 = vld [vmem:[%s2206_s3 + $0x590] sm:$0xff] }
 0x128   : > { %1110 = vmatprep.mubr.f32.mxu1 %v373_v44  ;;  %1415 = vmatprep.mubr.f32.mxu0 %v375_v45  ;;  %v469_v44 = vld [vmem:[%s2206_s3 + $0x5b8] sm:$0xff]  ;;  %v471_v45 = vld [vmem:[%s2206_s3 + $0x5c8] sm:$0xff] }
 0x12b   : > { %1111 = vmatmul.mubr.f32.gmra.mrb[76].mxu1 %v372_v46  ;;  %1416 = vmatmul.mubr.f32.gmra.mrb[76].mxu0 %v374_v47 }
 0x12c   : > { %1115 = vmatprep.mubr.f32.mxu1 %v379_v48  ;;  %1420 = vmatprep.mubr.f32.mxu0 %v381_v49 }
 0x12f   : > { %1116 = vmatmul.mubr.f32.gmra.mrb[78].mxu1 %v378_v50  ;;  %1421 = vmatmul.mubr.f32.gmra.mrb[78].mxu0 %v380_v51  ;;  %v468_v50 = vld [vmem:[%s2206_s3 + $0x5b0] sm:$0xff]  ;;  %v470_v51 = vld [vmem:[%s2206_s3 + $0x5c0] sm:$0xff] }
 0x130   : > { %1120 = vmatprep.mubr.f32.mxu1 %v385_v52  ;;  %1425 = vmatprep.mubr.f32.mxu0 %v387_v53  ;;  %v475_v52 = vld [vmem:[%s2206_s3 + $0x5e8] sm:$0xff]  ;;  %v477_v53 = vld [vmem:[%s2206_s3 + $0x5f8] sm:$0xff] }
 0x133   : > { %1121 = vmatmul.mubr.f32.gmra.mrb[80].mxu1 %v384_v54  ;;  %1426 = vmatmul.mubr.f32.gmra.mrb[80].mxu0 %v386_v55 }
 0x134   : > { %1125 = vmatprep.mubr.f32.mxu1 %v391_v56  ;;  %1430 = vmatprep.mubr.f32.mxu0 %v393_v57 }
 0x137   : > { %1126 = vmatmul.mubr.f32.gmra.mrb[82].mxu1 %v390_v58  ;;  %1431 = vmatmul.mubr.f32.gmra.mrb[82].mxu0 %v392_v59  ;;  %v474_v58 = vld [vmem:[%s2206_s3 + $0x5e0] sm:$0xff]  ;;  %v476_v59 = vld [vmem:[%s2206_s3 + $0x5f0] sm:$0xff] }
 0x138   : > { %1130 = vmatprep.mubr.f32.mxu1 %v397_v60  ;;  %1435 = vmatprep.mubr.f32.mxu0 %v399_v61  ;;  %v481_v60 = vld [vmem:[%s2206_s3 + $0x618] sm:$0xff]  ;;  %v483_v61 = vld [vmem:[%s2206_s3 + $0x628] sm:$0xff] }
 0x13b   : > { %1131 = vmatmul.mubr.f32.gmra.mrb[84].mxu1 %v396_v62  ;;  %1436 = vmatmul.mubr.f32.gmra.mrb[84].mxu0 %v398_v63 }
 0x13c   : > { %1135 = vmatprep.mubr.f32.mxu1 %v403_v0  ;;  %1440 = vmatprep.mubr.f32.mxu0 %v405_v1 }
 0x13f   : > { %1136 = vmatmul.mubr.f32.gmra.mrb[86].mxu1 %v402_v2  ;;  %1441 = vmatmul.mubr.f32.gmra.mrb[86].mxu0 %v404_v4  ;;  %v480_v2 = vld [vmem:[%s2206_s3 + $0x610] sm:$0xff]  ;;  %v482_v4 = vld [vmem:[%s2206_s3 + $0x620] sm:$0xff] }
 0x140   : > { %1140 = vmatprep.mubr.f32.mxu1 %v409_v5  ;;  %1445 = vmatprep.mubr.f32.mxu0 %v411_v6  ;;  %v487_v5 = vld [vmem:[%s2206_s3 + $0x648] sm:$0xff]  ;;  %v489_v6 = vld [vmem:[%s2206_s3 + $0x658] sm:$0xff] }
 0x143   : > { %1141 = vmatmul.mubr.f32.gmra.mrb[88].mxu1 %v408_v7  ;;  %1446 = vmatmul.mubr.f32.gmra.mrb[88].mxu0 %v410_v8 }
 0x144   : > { %1145 = vmatprep.mubr.f32.mxu1 %v415_v9  ;;  %1450 = vmatprep.mubr.f32.mxu0 %v417_v10 }
 0x147   : > { %1146 = vmatmul.mubr.f32.gmra.mrb[90].mxu1 %v414_v11  ;;  %1451 = vmatmul.mubr.f32.gmra.mrb[90].mxu0 %v416_v12  ;;  %v486_v11 = vld [vmem:[%s2206_s3 + $0x640] sm:$0xff]  ;;  %v488_v12 = vld [vmem:[%s2206_s3 + $0x650] sm:$0xff] }
 0x148   : > { %1150 = vmatprep.mubr.f32.mxu1 %v421_v13  ;;  %1455 = vmatprep.mubr.f32.mxu0 %v423_v14  ;;  %v493_v13 = vld [vmem:[%s2206_s3 + $0x678] sm:$0xff]  ;;  %v495_v14 = vld [vmem:[%s2206_s3 + $0x688] sm:$0xff] }
 0x14b   : > { %1151 = vmatmul.mubr.f32.gmra.mrb[92].mxu1 %v420_v15  ;;  %1456 = vmatmul.mubr.f32.gmra.mrb[92].mxu0 %v422_v16 }
 0x14c   : > { %1155 = vmatprep.mubr.f32.mxu1 %v427_v17  ;;  %1460 = vmatprep.mubr.f32.mxu0 %v429_v18 }
 0x14f   : > { %1156 = vmatmul.mubr.f32.gmra.mrb[94].mxu1 %v426_v19  ;;  %1461 = vmatmul.mubr.f32.gmra.mrb[94].mxu0 %v428_v20  ;;  %v492_v19 = vld [vmem:[%s2206_s3 + $0x670] sm:$0xff]  ;;  %v494_v20 = vld [vmem:[%s2206_s3 + $0x680] sm:$0xff] }
 0x150   : > { %1160 = vmatprep.mubr.f32.mxu1 %v433_v21  ;;  %1465 = vmatprep.mubr.f32.mxu0 %v435_v22  ;;  %v499_v21 = vld [vmem:[%s2206_s3 + $0x6a8] sm:$0xff]  ;;  %v501_v22 = vld [vmem:[%s2206_s3 + $0x6b8] sm:$0xff] }
 0x153   : > { %1161 = vmatmul.mubr.f32.gmra.mrb[96].mxu1 %v432_v23  ;;  %1466 = vmatmul.mubr.f32.gmra.mrb[96].mxu0 %v434_v24 }
 0x154   : > { %1165 = vmatprep.mubr.f32.mxu1 %v439_v25  ;;  %1470 = vmatprep.mubr.f32.mxu0 %v441_v26 }
 0x157   : > { %1166 = vmatmul.mubr.f32.gmra.mrb[98].mxu1 %v438_v3  ;;  %1471 = vmatmul.mubr.f32.gmra.mrb[98].mxu0 %v440_v27  ;;  %v498_v3 = vld [vmem:[%s2206_s3 + $0x6a0] sm:$0xff]  ;;  %v500_v27 = vld [vmem:[%s2206_s3 + $0x6b0] sm:$0xff] }
 0x158   : > { %1170 = vmatprep.mubr.f32.mxu1 %v445_v28  ;;  %1475 = vmatprep.mubr.f32.mxu0 %v447_v29  ;;  %v505_v28 = vld [vmem:[%s2206_s3 + $0x6d8] sm:$0xff]  ;;  %v507_v29 = vld [vmem:[%s2206_s3 + $0x6e8] sm:$0xff] }
 0x15b   : > { %1171 = vmatmul.mubr.f32.gmra.mrb[100].mxu1 %v444_v30  ;;  %1476 = vmatmul.mubr.f32.gmra.mrb[100].mxu0 %v446_v31 }
 0x15c   : > { %1175 = vmatprep.mubr.f32.mxu1 %v451_v32  ;;  %1480 = vmatprep.mubr.f32.mxu0 %v453_v33 }
 0x15f   : > { %1176 = vmatmul.mubr.f32.gmra.mrb[102].mxu1 %v450_v34  ;;  %1481 = vmatmul.mubr.f32.gmra.mrb[102].mxu0 %v452_v35  ;;  %v504_v34 = vld [vmem:[%s2206_s3 + $0x6d0] sm:$0xff]  ;;  %v506_v35 = vld [vmem:[%s2206_s3 + $0x6e0] sm:$0xff] }
 0x160   : > { %1180 = vmatprep.mubr.f32.mxu1 %v457_v36  ;;  %1485 = vmatprep.mubr.f32.mxu0 %v459_v37  ;;  %v511_v36 = vld [vmem:[%s2206_s3 + $0x708] sm:$0xff]  ;;  %v513_v37 = vld [vmem:[%s2206_s3 + $0x718] sm:$0xff] }
 0x163   : > { %1181 = vmatmul.mubr.f32.gmra.mrb[104].mxu1 %v456_v38  ;;  %1486 = vmatmul.mubr.f32.gmra.mrb[104].mxu0 %v458_v39 }
 0x164   : > { %1185 = vmatprep.mubr.f32.mxu1 %v463_v40  ;;  %1490 = vmatprep.mubr.f32.mxu0 %v465_v41 }
 0x166   : > { %v2789_v46 = vpop.f32.mrb[0].mxu1  ;;  %v2791_v47 = vpop.f32.mrb[0].mxu0 }
 0x167   : > { %v859_v48 = vpop.f32.mrb[1].mxu1  ;;  %1186 = vmatmul.mubr.f32.gmra.mrb[106].mxu1 %v462_v42  ;;  %v739_v49 = vpop.f32.mrb[1].mxu0  ;;  %1491 = vmatmul.mubr.f32.gmra.mrb[106].mxu0 %v464_v43  ;;  %v510_v42 = vld [vmem:[%s2206_s3 + $0x700] sm:$0xff]  ;;  %v512_v43 = vld [vmem:[%s2206_s3 + $0x710] sm:$0xff] }
 0x168   : > { %1190 = vmatprep.mubr.f32.mxu1 %v469_v44  ;;  %1495 = vmatprep.mubr.f32.mxu0 %v471_v45  ;;  %v517_v44 = vld [vmem:[%s2206_s3 + $0x738] sm:$0xff]  ;;  %v519_v45 = vld [vmem:[%s2206_s3 + $0x748] sm:$0xff] }
 0x16a   : > { %v2797_v54 = vpop.f32.mrb[2].mxu1  ;;  %v2799_v55 = vpop.f32.mrb[2].mxu0 }
 0x16b   : > { %v864_v56 = vpop.f32.mrb[3].mxu1  ;;  %1191 = vmatmul.mubr.f32.gmra.mrb[108].mxu1 %v468_v50  ;;  %v744_v57 = vpop.f32.mrb[3].mxu0  ;;  %1496 = vmatmul.mubr.f32.gmra.mrb[108].mxu0 %v470_v51 }
 0x16c   : > { %1195 = vmatprep.mubr.f32.mxu1 %v475_v52  ;;  %1500 = vmatprep.mubr.f32.mxu0 %v477_v53  ;;  %v516_v52 = vld [vmem:[%s2206_s3 + $0x730] sm:$0xff]  ;;  %v518_v53 = vld [vmem:[%s2206_s3 + $0x740] sm:$0xff]  ;;  %v523_v56 = vld [vmem:[%s2206_s3 + $0x768] sm:$0xff] }
 0x16d   : > { %v525_v57 = vld [vmem:[%s2206_s3 + $0x778] sm:$0xff] }
 0x16e   : > { %v2805_v62 = vpop.f32.mrb[4].mxu1  ;;  %v2807_v63 = vpop.f32.mrb[4].mxu0 }
 0x16f   : > { %v869_v0 = vpop.f32.mrb[5].mxu1  ;;  %1196 = vmatmul.mubr.f32.gmra.mrb[110].mxu1 %v474_v58  ;;  %v749_v1 = vpop.f32.mrb[5].mxu0  ;;  %1501 = vmatmul.mubr.f32.gmra.mrb[110].mxu0 %v476_v59 }
 0x170   : > { %1200 = vmatprep.mubr.f32.mxu1 %v481_v60  ;;  %1505 = vmatprep.mubr.f32.mxu0 %v483_v61  ;;  %v522_v0 = vld [vmem:[%s2206_s3 + $0x760] sm:$0xff]  ;;  %v524_v1 = vld [vmem:[%s2206_s3 + $0x770] sm:$0xff] }
 0x172   : > { %v2813_v7 = vpop.f32.mrb[6].mxu1  ;;  %v2815_v8 = vpop.f32.mrb[6].mxu0 }
 0x173   : > { %v874_v9 = vpop.f32.mrb[7].mxu1  ;;  %1201 = vmatmul.mubr.f32.gmra.mrb[112].mxu1 %v480_v2  ;;  %v754_v10 = vpop.f32.mrb[7].mxu0  ;;  %1506 = vmatmul.mubr.f32.gmra.mrb[112].mxu0 %v482_v4  ;;  %v529_v2 = vld [vmem:[%s2206_s3 + $0x798] sm:$0xff]  ;;  %v531_v4 = vld [vmem:[%s2206_s3 + $0x7a8] sm:$0xff] }
 0x174   : > { %1205 = vmatprep.mubr.f32.mxu1 %v487_v5  ;;  %1510 = vmatprep.mubr.f32.mxu0 %v489_v6 }
 0x176   : > { %v2821_v15 = vpop.f32.mrb[8].mxu1  ;;  %v2823_v16 = vpop.f32.mrb[8].mxu0 }
 0x177   : > { %v879_v17 = vpop.f32.mrb[9].mxu1  ;;  %1206 = vmatmul.mubr.f32.gmra.mrb[114].mxu1 %v486_v11  ;;  %v759_v18 = vpop.f32.mrb[9].mxu0  ;;  %1511 = vmatmul.mubr.f32.gmra.mrb[114].mxu0 %v488_v12  ;;  %v528_v11 = vld [vmem:[%s2206_s3 + $0x790] sm:$0xff]  ;;  %v530_v12 = vld [vmem:[%s2206_s3 + $0x7a0] sm:$0xff] }
 0x178   : > { %1210 = vmatprep.mubr.f32.mxu1 %v493_v13  ;;  %1515 = vmatprep.mubr.f32.mxu0 %v495_v14  ;;  %v535_v13 = vld [vmem:[%s2206_s3 + $0x7c8] sm:$0xff]  ;;  %v537_v14 = vld [vmem:[%s2206_s3 + $0x7d8] sm:$0xff] }
 0x17a   : > { %v2829_v23 = vpop.f32.mrb[10].mxu1  ;;  %v2831_v24 = vpop.f32.mrb[10].mxu0 }
 0x17b   : > { %v884_v25 = vpop.f32.mrb[11].mxu1  ;;  %1211 = vmatmul.mubr.f32.gmra.mrb[116].mxu1 %v492_v19  ;;  %v764_v26 = vpop.f32.mrb[11].mxu0  ;;  %1516 = vmatmul.mubr.f32.gmra.mrb[116].mxu0 %v494_v20 }
 0x17c   : > { %1215 = vmatprep.mubr.f32.mxu1 %v499_v21  ;;  %1520 = vmatprep.mubr.f32.mxu0 %v501_v22  ;;  %v534_v21 = vld [vmem:[%s2206_s3 + $0x7c0] sm:$0xff]  ;;  %v536_v22 = vld [vmem:[%s2206_s3 + $0x7d0] sm:$0xff]  ;;  %v541_v25 = vld [vmem:[%s2206_s3 + $0x7f8] sm:$0xff] }
 0x17d   : > { %v543_v26 = vld [vmem:[%s2206_s3 + $0x808] sm:$0xff] }
 0x17e   : > { %v2837_v30 = vpop.f32.mrb[12].mxu1  ;;  %v2839_v31 = vpop.f32.mrb[12].mxu0 }
 0x17f   : > { %v889_v32 = vpop.f32.mrb[13].mxu1  ;;  %1216 = vmatmul.mubr.f32.gmra.mrb[118].mxu1 %v498_v3  ;;  %v769_v33 = vpop.f32.mrb[13].mxu0  ;;  %1521 = vmatmul.mubr.f32.gmra.mrb[118].mxu0 %v500_v27 }
 0x180   : > { %1220 = vmatprep.mubr.f32.mxu1 %v505_v28  ;;  %1525 = vmatprep.mubr.f32.mxu0 %v507_v29  ;;  %v540_v32 = vld [vmem:[%s2206_s3 + $0x7f0] sm:$0xff]  ;;  %v542_v33 = vld [vmem:[%s2206_s3 + $0x800] sm:$0xff] }
 0x182   : > { %v2845_v38 = vpop.f32.mrb[14].mxu1  ;;  %v2847_v39 = vpop.f32.mrb[14].mxu0 }
 0x183   : > { %v894_v40 = vpop.f32.mrb[15].mxu1  ;;  %1221 = vmatmul.mubr.f32.gmra.mrb[120].mxu1 %v504_v34  ;;  %v774_v41 = vpop.f32.mrb[15].mxu0  ;;  %1526 = vmatmul.mubr.f32.gmra.mrb[120].mxu0 %v506_v35  ;;  %v547_v34 = vld [vmem:[%s2206_s3 + $0x828] sm:$0xff]  ;;  %v549_v35 = vld [vmem:[%s2206_s3 + $0x838] sm:$0xff] }
 0x184   : > { %1225 = vmatprep.mubr.f32.mxu1 %v511_v36  ;;  %1530 = vmatprep.mubr.f32.mxu0 %v513_v37 }
 0x186   : > { %v2853_v48 = vpop.f32.mrb[16].mxu1  ;;  %v2855_v49 = vpop.f32.mrb[16].mxu0 }
 0x187   : > { %v899_v50 = vpop.f32.mrb[17].mxu1  ;;  %1226 = vmatmul.mubr.f32.gmra.mrb[122].mxu1 %v510_v42  ;;  %v779_v51 = vpop.f32.mrb[17].mxu0  ;;  %1531 = vmatmul.mubr.f32.gmra.mrb[122].mxu0 %v512_v43  ;;  %v546_v42 = vld [vmem:[%s2206_s3 + $0x820] sm:$0xff]  ;;  %v548_v43 = vld [vmem:[%s2206_s3 + $0x830] sm:$0xff] }
 0x188   : > { %1230 = vmatprep.mubr.f32.mxu1 %v517_v44  ;;  %1535 = vmatprep.mubr.f32.mxu0 %v519_v45  ;;  %v553_v44 = vld [vmem:[%s2206_s3 + $0x858] sm:$0xff]  ;;  %v555_v45 = vld [vmem:[%s2206_s3 + $0x868] sm:$0xff] }
 0x18a   : > { %v2861_v58 = vpop.f32.mrb[18].mxu1  ;;  %v2863_v59 = vpop.f32.mrb[18].mxu0 }
 0x18b   : > { %v904_v60 = vpop.f32.mrb[19].mxu1  ;;  %1231 = vmatmul.mubr.f32.gmra.mrb[124].mxu1 %v516_v52  ;;  %v784_v61 = vpop.f32.mrb[19].mxu0  ;;  %1536 = vmatmul.mubr.f32.gmra.mrb[124].mxu0 %v518_v53 }
 0x18c   : > { %1235 = vmatprep.mubr.f32.mxu1 %v523_v56  ;;  %1540 = vmatprep.mubr.f32.mxu0 %v525_v57  ;;  %v552_v56 = vld [vmem:[%s2206_s3 + $0x850] sm:$0xff]  ;;  %v554_v57 = vld [vmem:[%s2206_s3 + $0x860] sm:$0xff]  ;;  %v559_v60 = vld [vmem:[%s2206_s3 + $0x888] sm:$0xff] }
 0x18d   : > { %v561_v61 = vld [vmem:[%s2206_s3 + $0x898] sm:$0xff] }
 0x18e   : > { %v2869_v5 = vpop.f32.mrb[20].mxu1  ;;  %v2871_v6 = vpop.f32.mrb[20].mxu0 }
 0x18f   : > { %v909_v9 = vpop.f32.mrb[21].mxu1  ;;  %1236 = vmatmul.mubr.f32.gmra.mrb[126].mxu1 %v522_v0  ;;  %v789_v10 = vpop.f32.mrb[21].mxu0  ;;  %1541 = vmatmul.mubr.f32.gmra.mrb[126].mxu0 %v524_v1 }
 0x190   : > { %1240 = vmatprep.mubr.f32.mxu1 %v529_v2  ;;  %1545 = vmatprep.mubr.f32.mxu0 %v531_v4  ;;  %v558_v9 = vld [vmem:[%s2206_s3 + $0x880] sm:$0xff]  ;;  %v560_v10 = vld [vmem:[%s2206_s3 + $0x890] sm:$0xff] }
 0x192   : > { %v2877_v17 = vpop.f32.mrb[22].mxu1  ;;  %v2879_v18 = vpop.f32.mrb[22].mxu0 }
 0x193   : > { %v914_v19 = vpop.f32.mrb[23].mxu1  ;;  %1241 = vmatmul.mubr.f32.gmra.mrb[128].mxu1 %v528_v11  ;;  %v794_v20 = vpop.f32.mrb[23].mxu0  ;;  %1546 = vmatmul.mubr.f32.gmra.mrb[128].mxu0 %v530_v12  ;;  %v565_v11 = vld [vmem:[%s2206_s3 + $0x8b8] sm:$0xff]  ;;  %v567_v12 = vld [vmem:[%s2206_s3 + $0x8c8] sm:$0xff] }
 0x194   : > { %1245 = vmatprep.mubr.f32.mxu1 %v535_v13  ;;  %1550 = vmatprep.mubr.f32.mxu0 %v537_v14 }
 0x196   : > { %v2885_v3 = vpop.f32.mrb[24].mxu1  ;;  %v2887_v27 = vpop.f32.mrb[24].mxu0 }
 0x197   : > { %v919_v28 = vpop.f32.mrb[25].mxu1  ;;  %1246 = vmatmul.mubr.f32.gmra.mrb[130].mxu1 %v534_v21  ;;  %v799_v29 = vpop.f32.mrb[25].mxu0  ;;  %1551 = vmatmul.mubr.f32.gmra.mrb[130].mxu0 %v536_v22  ;;  %v564_v21 = vld [vmem:[%s2206_s3 + $0x8b0] sm:$0xff]  ;;  %v566_v22 = vld [vmem:[%s2206_s3 + $0x8c0] sm:$0xff] }
 0x198   : > { %1250 = vmatprep.mubr.f32.mxu1 %v541_v25  ;;  %1555 = vmatprep.mubr.f32.mxu0 %v543_v26  ;;  %v571_v25 = vld [vmem:[%s2206_s3 + $0x8e8] sm:$0xff]  ;;  %v573_v26 = vld [vmem:[%s2206_s3 + $0x8f8] sm:$0xff] }
 0x19a   : > { %v2893_v36 = vpop.f32.mrb[26].mxu1  ;;  %v2895_v37 = vpop.f32.mrb[26].mxu0 }
 0x19b   : > { %v924_v40 = vpop.f32.mrb[27].mxu1  ;;  %1251 = vmatmul.mubr.f32.gmra.mrb[132].mxu1 %v540_v32  ;;  %v804_v41 = vpop.f32.mrb[27].mxu0  ;;  %1556 = vmatmul.mubr.f32.gmra.mrb[132].mxu0 %v542_v33 }
 0x19c   : > { %1255 = vmatprep.mubr.f32.mxu1 %v547_v34  ;;  %1560 = vmatprep.mubr.f32.mxu0 %v549_v35  ;;  %v570_v34 = vld [vmem:[%s2206_s3 + $0x8e0] sm:$0xff]  ;;  %v572_v35 = vld [vmem:[%s2206_s3 + $0x8f0] sm:$0xff] }
 0x19e   : > { %v2901_v50 = vpop.f32.mrb[28].mxu1  ;;  %v2903_v51 = vpop.f32.mrb[28].mxu0 }
 0x19f   : > { %v929_v52 = vpop.f32.mrb[29].mxu1  ;;  %1256 = vmatmul.mubr.f32.gmra.mrb[134].mxu1 %v546_v42  ;;  %v809_v53 = vpop.f32.mrb[29].mxu0  ;;  %1561 = vmatmul.mubr.f32.gmra.mrb[134].mxu0 %v548_v43 }
 0x1a0   : > { %1260 = vmatprep.mubr.f32.mxu1 %v553_v44  ;;  %1565 = vmatprep.mubr.f32.mxu0 %v555_v45 }
 0x1a2   : > { %v2909_v0 = vpop.f32.mrb[30].mxu1  ;;  %v2911_v1 = vpop.f32.mrb[30].mxu0 }
 0x1a3   : > { %v934_v2 = vpop.f32.mrb[31].mxu1  ;;  %1261 = vmatmul.mubr.f32.gmra.mrb[136].mxu1 %v552_v56  ;;  %v814_v4 = vpop.f32.mrb[31].mxu0  ;;  %1566 = vmatmul.mubr.f32.gmra.mrb[136].mxu0 %v554_v57 }
 0x1a4   : > { %1265 = vmatprep.mubr.f32.mxu1 %v559_v60  ;;  %1570 = vmatprep.mubr.f32.mxu0 %v561_v61 }
 0x1a6   : > { %v2917_v13 = vpop.f32.mrb[32].mxu1  ;;  %v2919_v14 = vpop.f32.mrb[32].mxu0 }
 0x1a7   : > { %v939_v19 = vpop.f32.mrb[33].mxu1  ;;  %1266 = vmatmul.mubr.f32.gmra.mrb[138].mxu1 %v558_v9  ;;  %v819_v20 = vpop.f32.mrb[33].mxu0  ;;  %1571 = vmatmul.mubr.f32.gmra.mrb[138].mxu0 %v560_v10 }
 0x1a8   : > { %1270 = vmatprep.mubr.f32.mxu1 %v565_v11  ;;  %1575 = vmatprep.mubr.f32.mxu0 %v567_v12 }
 0x1aa   : > { %v2925_v28 = vpop.f32.mrb[34].mxu1  ;;  %v2927_v29 = vpop.f32.mrb[34].mxu0 }
 0x1ab   : > { %v944_v32 = vpop.f32.mrb[35].mxu1  ;;  %1271 = vmatmul.mubr.f32.gmra.mrb[140].mxu1 %v564_v21  ;;  %v824_v33 = vpop.f32.mrb[35].mxu0  ;;  %1576 = vmatmul.mubr.f32.gmra.mrb[140].mxu0 %v566_v22 }
 0x1ac   : > { %1275 = vmatprep.mubr.f32.mxu1 %v571_v25  ;;  %1580 = vmatprep.mubr.f32.mxu0 %v573_v26 }
 0x1ae   : > { %v2931_v40 = vpop.f32.mrb[36].mxu1  ;;  %v2933_v41 = vpop.f32.mrb[36].mxu0 }
 0x1af   : > { %v949_v42 = vpop.f32.mrb[37].mxu1  ;;  %1276 = vmatmul.mubr.f32.gmra.mrb[142].mxu1 %v570_v34  ;;  %v829_v43 = vpop.f32.mrb[37].mxu0  ;;  %1581 = vmatmul.mubr.f32.gmra.mrb[142].mxu0 %v572_v35 }
 0x1b0   : > { %v238_v43 = vld [vmem:[%s3359_s2] sm:$0xff] }
 0x1b2   : > { %v2935_v44 = vpop.f32.mrb[38].mxu1  ;;  %v2937_v45 = vpop.f32.mrb[38].mxu0 }
 0x1b3   : > { %v954_v52 = vpop.f32.mrb[39].mxu1  ;;  %v834_v53 = vpop.f32.mrb[39].mxu0 }
 0x1b6   : > { %v2939_v56 = vpop.f32.mrb[40].mxu1  ;;  %v2941_v57 = vpop.f32.mrb[40].mxu0 }
 0x1b7   : > { %v959_v60 = vpop.f32.mrb[41].mxu1  ;;  %v839_v61 = vpop.f32.mrb[41].mxu0 }
 0x1ba   : > { %v2943_v2 = vpop.f32.mrb[42].mxu1  ;;  %v2945_v4 = vpop.f32.mrb[42].mxu0 }
 0x1bb   : > { %v964_v9 = vpop.f32.mrb[43].mxu1  ;;  %v844_v10 = vpop.f32.mrb[43].mxu0 }
 0x1be   : > { %v2947_v11 = vpop.f32.mrb[44].mxu1  ;;  %v2949_v12 = vpop.f32.mrb[44].mxu0 }
 0x1bf   : > { %v969_v19 = vpop.f32.mrb[45].mxu1  ;;  %v849_v20 = vpop.f32.mrb[45].mxu0 }
 0x1c0   : > { %v239_v20 = vld [vmem:[%s3359_s2 + $0x8] sm:$0xff] }
 0x1c2   : > { %v2951_v21 = vpop.f32.mrb[46].mxu1  ;;  %v2953_v22 = vpop.f32.mrb[46].mxu0 }
 0x1c3   : > { %v974_v25 = vpop.f32.mrb[47].mxu1  ;;  %v854_v26 = vpop.f32.mrb[47].mxu0 }
 0x1c6   : > { %v1042_v32 = vpop.f32.mrb[48].mxu1  ;;  %v1347_v33 = vpop.f32.mrb[48].mxu0 }
 0x1c7   : > { %v1043_v34 = vadd.f32 %v1042_v32, %v2791_v47  ;;  %v1044_v35 = vpop.f32.mrb[49].mxu1  ;;  %v1349_v42 = vpop.f32.mrb[49].mxu0 }
 0x1c9   : > { %v1348_v52 = vadd.f32 %v1347_v33, %v1043_v34 }
 0x1ca   : > { %v1047_v53 = vpop.f32.mrb[50].mxu1  ;;  %v1352_v60 = vpop.f32.mrb[50].mxu0 }
 0x1cb   : > { %v1586_v61 = vadd.f32 %v1348_v52, %v238_v43  ;;  %v1048_v9 = vadd.f32 %v1047_v53, %v2799_v55  ;;  %v1049_v10 = vpop.f32.mrb[51].mxu1  ;;  %v1354_v19 = vpop.f32.mrb[51].mxu0  ;;  %v240_v55 = vld [vmem:[%s3359_s2 + $0x10] sm:$0xff] }
 0x1cd   : > { %1635 = vst.msk [vmem:[%s3359_s2] sm:$0xff] %vm1634_vm1, %v1586_v61  ;;  %v1353_v47 = vadd.f32 %v1352_v60, %v1048_v9 }
 0x1ce   : > { %v1052_v25 = vpop.f32.mrb[52].mxu1  ;;  %v1357_v26 = vpop.f32.mrb[52].mxu0 }
 0x1cf   : > { %v1587_v32 = vadd.f32 %v1353_v47, %v239_v20  ;;  %v1053_v33 = vadd.f32 %v1052_v25, %v2807_v63  ;;  %v1054_v34 = vpop.f32.mrb[53].mxu1  ;;  %v1359_v35 = vpop.f32.mrb[53].mxu0  ;;  %v241_v63 = vld [vmem:[%s3359_s2 + $0x18] sm:$0xff] }
 0x1d1   : > { %1636 = vst.msk [vmem:[%s3359_s2 + $0x8] sm:$0xff] %vm1634_vm1, %v1587_v32  ;;  %v1358_v42 = vadd.f32 %v1357_v26, %v1053_v33 }
 0x1d2   : > { %v1057_v43 = vpop.f32.mrb[54].mxu1  ;;  %v1362_v52 = vpop.f32.mrb[54].mxu0 }
 0x1d3   : > { %v1588_v53 = vadd.f32 %v1358_v42, %v240_v55  ;;  %v1058_v60 = vadd.f32 %v1057_v43, %v2815_v8  ;;  %v1059_v61 = vpop.f32.mrb[55].mxu1  ;;  %v1364_v9 = vpop.f32.mrb[55].mxu0  ;;  %v242_v8 = vld [vmem:[%s3359_s2 + $0x20] sm:$0xff] }
 0x1d5   : > { %1637 = vst.msk [vmem:[%s3359_s2 + $0x10] sm:$0xff] %vm1634_vm1, %v1588_v53  ;;  %v1363_v10 = vadd.f32 %v1362_v52, %v1058_v60 }
 0x1d6   : > { %v1062_v19 = vpop.f32.mrb[56].mxu1  ;;  %v1367_v20 = vpop.f32.mrb[56].mxu0 }
 0x1d7   : > { %v1589_v47 = vadd.f32 %v1363_v10, %v241_v63  ;;  %v1063_v25 = vadd.f32 %v1062_v19, %v2823_v16  ;;  %v1064_v26 = vpop.f32.mrb[57].mxu1  ;;  %v1369_v32 = vpop.f32.mrb[57].mxu0  ;;  %v243_v16 = vld [vmem:[%s3359_s2 + $0x28] sm:$0xff] }
 0x1d9   : > { %1638 = vst.msk [vmem:[%s3359_s2 + $0x18] sm:$0xff] %vm1634_vm1, %v1589_v47  ;;  %v1368_v33 = vadd.f32 %v1367_v20, %v1063_v25 }
 0x1da   : > { %v1067_v34 = vpop.f32.mrb[58].mxu1  ;;  %v1372_v35 = vpop.f32.mrb[58].mxu0 }
 0x1db   : > { %v1590_v55 = vadd.f32 %v1368_v33, %v242_v8  ;;  %v1068_v42 = vadd.f32 %v1067_v34, %v2831_v24  ;;  %v1069_v43 = vpop.f32.mrb[59].mxu1  ;;  %v1374_v52 = vpop.f32.mrb[59].mxu0  ;;  %v244_v24 = vld [vmem:[%s3359_s2 + $0x30] sm:$0xff] }
 0x1dd   : > { %1639 = vst.msk [vmem:[%s3359_s2 + $0x20] sm:$0xff] %vm1634_vm1, %v1590_v55  ;;  %v1373_v53 = vadd.f32 %v1372_v35, %v1068_v42 }
 0x1de   : > { %v1072_v60 = vpop.f32.mrb[60].mxu1  ;;  %v1377_v61 = vpop.f32.mrb[60].mxu0 }
 0x1df   : > { %v1591_v9 = vadd.f32 %v1373_v53, %v243_v16  ;;  %v1073_v63 = vadd.f32 %v1072_v60, %v2839_v31  ;;  %v1074_v10 = vpop.f32.mrb[61].mxu1  ;;  %v1379_v19 = vpop.f32.mrb[61].mxu0  ;;  %v245_v31 = vld [vmem:[%s3359_s2 + $0x38] sm:$0xff] }
 0x1e1   : > { %1640 = vst.msk [vmem:[%s3359_s2 + $0x28] sm:$0xff] %vm1634_vm1, %v1591_v9  ;;  %v1378_v20 = vadd.f32 %v1377_v61, %v1073_v63 }
 0x1e2   : > { %v1077_v47 = vpop.f32.mrb[62].mxu1  ;;  %v1382_v25 = vpop.f32.mrb[62].mxu0 }
 0x1e3   : > { %v1592_v26 = vadd.f32 %v1378_v20, %v244_v24  ;;  %v1078_v32 = vadd.f32 %v1077_v47, %v2847_v39  ;;  %v1079_v8 = vpop.f32.mrb[63].mxu1  ;;  %v1384_v33 = vpop.f32.mrb[63].mxu0  ;;  %v246_v39 = vld [vmem:[%s3359_s2 + $0x40] sm:$0xff] }
 0x1e5   : > { %1641 = vst.msk [vmem:[%s3359_s2 + $0x30] sm:$0xff] %vm1634_vm1, %v1592_v26  ;;  %v1383_v34 = vadd.f32 %v1382_v25, %v1078_v32 }
 0x1e6   : > { %v1082_v35 = vpop.f32.mrb[64].mxu1  ;;  %v1387_v55 = vpop.f32.mrb[64].mxu0 }
 0x1e7   : > { %v1593_v42 = vadd.f32 %v1383_v34, %v245_v31  ;;  %v1083_v43 = vadd.f32 %v1082_v35, %v2855_v49  ;;  %v1084_v52 = vpop.f32.mrb[65].mxu1  ;;  %v1389_v16 = vpop.f32.mrb[65].mxu0  ;;  %v247_v49 = vld [vmem:[%s3359_s2 + $0x48] sm:$0xff] }
 0x1e9   : > { %1642 = vst.msk [vmem:[%s3359_s2 + $0x38] sm:$0xff] %vm1634_vm1, %v1593_v42  ;;  %v1388_v53 = vadd.f32 %v1387_v55, %v1083_v43 }
 0x1ea   : > { %v1087_v60 = vpop.f32.mrb[66].mxu1  ;;  %v1392_v61 = vpop.f32.mrb[66].mxu0 }
 0x1eb   : > { %v1594_v9 = vadd.f32 %v1388_v53, %v246_v39  ;;  %v1088_v63 = vadd.f32 %v1087_v60, %v2863_v59  ;;  %v1089_v10 = vpop.f32.mrb[67].mxu1  ;;  %v1394_v19 = vpop.f32.mrb[67].mxu0  ;;  %v248_v59 = vld [vmem:[%s3359_s2 + $0x50] sm:$0xff] }
 0x1ed   : > { %1643 = vst.msk [vmem:[%s3359_s2 + $0x40] sm:$0xff] %vm1634_vm1, %v1594_v9  ;;  %v1393_v24 = vadd.f32 %v1392_v61, %v1088_v63 }
 0x1ee   : > { %v1092_v20 = vpop.f32.mrb[68].mxu1  ;;  %v1397_v47 = vpop.f32.mrb[68].mxu0 }
 0x1ef   : > { %v1595_v25 = vadd.f32 %v1393_v24, %v247_v49  ;;  %v1093_v26 = vadd.f32 %v1092_v20, %v2871_v6  ;;  %v1094_v32 = vpop.f32.mrb[69].mxu1  ;;  %v1399_v8 = vpop.f32.mrb[69].mxu0  ;;  %v249_v6 = vld [vmem:[%s3359_s2 + $0x58] sm:$0xff] }
 0x1f1   : > { %1644 = vst.msk [vmem:[%s3359_s2 + $0x48] sm:$0xff] %vm1634_vm1, %v1595_v25  ;;  %v1398_v33 = vadd.f32 %v1397_v47, %v1093_v26 }
 0x1f2   : > { %v1097_v31 = vpop.f32.mrb[70].mxu1  ;;  %v1402_v34 = vpop.f32.mrb[70].mxu0 }
 0x1f3   : > { %v1596_v35 = vadd.f32 %v1398_v33, %v248_v59  ;;  %v1098_v55 = vadd.f32 %v1097_v31, %v2879_v18  ;;  %v1099_v42 = vpop.f32.mrb[71].mxu1  ;;  %v1404_v43 = vpop.f32.mrb[71].mxu0  ;;  %v250_v18 = vld [vmem:[%s3359_s2 + $0x60] sm:$0xff] }
 0x1f5   : > { %1645 = vst.msk [vmem:[%s3359_s2 + $0x50] sm:$0xff] %vm1634_vm1, %v1596_v35  ;;  %v1403_v52 = vadd.f32 %v1402_v34, %v1098_v55 }
 0x1f6   : > { %v1102_v16 = vpop.f32.mrb[72].mxu1  ;;  %v1407_v39 = vpop.f32.mrb[72].mxu0 }
 0x1f7   : > { %v1597_v53 = vadd.f32 %v1403_v52, %v249_v6  ;;  %v1103_v60 = vadd.f32 %v1102_v16, %v2887_v27  ;;  %v1104_v61 = vpop.f32.mrb[73].mxu1  ;;  %v1409_v9 = vpop.f32.mrb[73].mxu0  ;;  %v251_v27 = vld [vmem:[%s3359_s2 + $0x68] sm:$0xff] }
 0x1f9   : > { %1646 = vst.msk [vmem:[%s3359_s2 + $0x58] sm:$0xff] %vm1634_vm1, %v1597_v53  ;;  %v1408_v63 = vadd.f32 %v1407_v39, %v1103_v60 }
 0x1fa   : > { %v1107_v10 = vpop.f32.mrb[74].mxu1  ;;  %v1412_v19 = vpop.f32.mrb[74].mxu0 }
 0x1fb   : > { %v1598_v49 = vadd.f32 %v1408_v63, %v250_v18  ;;  %v1108_v24 = vadd.f32 %v1107_v10, %v2895_v37  ;;  %v1109_v20 = vpop.f32.mrb[75].mxu1  ;;  %v1414_v47 = vpop.f32.mrb[75].mxu0  ;;  %v252_v37 = vld [vmem:[%s3359_s2 + $0x70] sm:$0xff] }
 0x1fd   : > { %1647 = vst.msk [vmem:[%s3359_s2 + $0x60] sm:$0xff] %vm1634_vm1, %v1598_v49  ;;  %v1413_v25 = vadd.f32 %v1412_v19, %v1108_v24 }
 0x1fe   : > { %v1112_v26 = vpop.f32.mrb[76].mxu1  ;;  %v1417_v32 = vpop.f32.mrb[76].mxu0 }
 0x1ff   : > { %v1599_v8 = vadd.f32 %v1413_v25, %v251_v27  ;;  %v1113_v59 = vadd.f32 %v1112_v26, %v2903_v51  ;;  %v1114_v33 = vpop.f32.mrb[77].mxu1  ;;  %v1419_v31 = vpop.f32.mrb[77].mxu0  ;;  %v253_v51 = vld [vmem:[%s3359_s2 + $0x78] sm:$0xff] }
 0x201   : > { %1648 = vst.msk [vmem:[%s3359_s2 + $0x68] sm:$0xff] %vm1634_vm1, %v1599_v8  ;;  %v1418_v34 = vadd.f32 %v1417_v32, %v1113_v59 }
 0x202   : > { %v1117_v35 = vpop.f32.mrb[78].mxu1  ;;  %v1422_v55 = vpop.f32.mrb[78].mxu0 }
 0x203   : > { %v1600_v42 = vadd.f32 %v1418_v34, %v252_v37  ;;  %v1118_v43 = vadd.f32 %v1117_v35, %v2911_v1  ;;  %v1119_v6 = vpop.f32.mrb[79].mxu1  ;;  %v1424_v52 = vpop.f32.mrb[79].mxu0  ;;  %v254_v1 = vld [vmem:[%s3359_s2 + $0x80] sm:$0xff] }
 0x205   : > { %1649 = vst.msk [vmem:[%s3359_s2 + $0x70] sm:$0xff] %vm1634_vm1, %v1600_v42  ;;  %v1423_v16 = vadd.f32 %v1422_v55, %v1118_v43 }
 0x206   : > { %v1122_v39 = vpop.f32.mrb[80].mxu1  ;;  %v1427_v53 = vpop.f32.mrb[80].mxu0 }
 0x207   : > { %v1601_v60 = vadd.f32 %v1423_v16, %v253_v51  ;;  %v1123_v61 = vadd.f32 %v1122_v39, %v2919_v14  ;;  %v1124_v9 = vpop.f32.mrb[81].mxu1  ;;  %v1429_v18 = vpop.f32.mrb[81].mxu0  ;;  %v255_v14 = vld [vmem:[%s3359_s2 + $0x88] sm:$0xff] }
 0x209   : > { %1650 = vst.msk [vmem:[%s3359_s2 + $0x78] sm:$0xff] %vm1634_vm1, %v1601_v60  ;;  %v1428_v63 = vadd.f32 %v1427_v53, %v1123_v61 }
 0x20a   : > { %v1127_v10 = vpop.f32.mrb[82].mxu1  ;;  %v1432_v19 = vpop.f32.mrb[82].mxu0 }
 0x20b   : > { %v1602_v49 = vadd.f32 %v1428_v63, %v254_v1  ;;  %v1128_v24 = vadd.f32 %v1127_v10, %v2927_v29  ;;  %v1129_v20 = vpop.f32.mrb[83].mxu1  ;;  %v1434_v47 = vpop.f32.mrb[83].mxu0  ;;  %v256_v29 = vld [vmem:[%s3359_s2 + $0x90] sm:$0xff] }
 0x20d   : > { %1651 = vst.msk [vmem:[%s3359_s2 + $0x80] sm:$0xff] %vm1634_vm1, %v1602_v49  ;;  %v1433_v27 = vadd.f32 %v1432_v19, %v1128_v24 }
 0x20e   : > { %v1132_v25 = vpop.f32.mrb[84].mxu1  ;;  %v1437_v26 = vpop.f32.mrb[84].mxu0 }
 0x20f   : > { %v1603_v32 = vadd.f32 %v1433_v27, %v255_v14  ;;  %v1133_v8 = vadd.f32 %v1132_v25, %v2933_v41  ;;  %v1134_v59 = vpop.f32.mrb[85].mxu1  ;;  %v1439_v33 = vpop.f32.mrb[85].mxu0  ;;  %v257_v41 = vld [vmem:[%s3359_s2 + $0x98] sm:$0xff] }
 0x211   : > { %1652 = vst.msk [vmem:[%s3359_s2 + $0x88] sm:$0xff] %vm1634_vm1, %v1603_v32  ;;  %v1438_v31 = vadd.f32 %v1437_v26, %v1133_v8 }
 0x212   : > { %v1137_v37 = vpop.f32.mrb[86].mxu1  ;;  %v1442_v34 = vpop.f32.mrb[86].mxu0 }
 0x213   : > { %v1604_v35 = vadd.f32 %v1438_v31, %v256_v29  ;;  %v1138_v55 = vadd.f32 %v1137_v37, %v2937_v45  ;;  %v1139_v42 = vpop.f32.mrb[87].mxu1  ;;  %v1444_v43 = vpop.f32.mrb[87].mxu0  ;;  %v258_v45 = vld [vmem:[%s3359_s2 + $0xa0] sm:$0xff] }
 0x215   : > { %1653 = vst.msk [vmem:[%s3359_s2 + $0x90] sm:$0xff] %vm1634_vm1, %v1604_v35  ;;  %v1443_v6 = vadd.f32 %v1442_v34, %v1138_v55 }
 0x216   : > { %v1142_v52 = vpop.f32.mrb[88].mxu1  ;;  %v1447_v51 = vpop.f32.mrb[88].mxu0 }
 0x217   : > { %v1605_v16 = vadd.f32 %v1443_v6, %v257_v41  ;;  %v1143_v39 = vadd.f32 %v1142_v52, %v2941_v57  ;;  %v1144_v53 = vpop.f32.mrb[89].mxu1  ;;  %v1449_v60 = vpop.f32.mrb[89].mxu0  ;;  %v259_v57 = vld [vmem:[%s3359_s2 + $0xa8] sm:$0xff] }
 0x219   : > { %1654 = vst.msk [vmem:[%s3359_s2 + $0x98] sm:$0xff] %vm1634_vm1, %v1605_v16  ;;  %v1448_v61 = vadd.f32 %v1447_v51, %v1143_v39 }
 0x21a   : > { %v1147_v9 = vpop.f32.mrb[90].mxu1  ;;  %v1452_v18 = vpop.f32.mrb[90].mxu0 }
 0x21b   : > { %v1606_v1 = vadd.f32 %v1448_v61, %v258_v45  ;;  %v1148_v63 = vadd.f32 %v1147_v9, %v2945_v4  ;;  %v1149_v10 = vpop.f32.mrb[91].mxu1  ;;  %v1454_v19 = vpop.f32.mrb[91].mxu0  ;;  %v260_v4 = vld [vmem:[%s3359_s2 + $0xb0] sm:$0xff] }
 0x21d   : > { %1655 = vst.msk [vmem:[%s3359_s2 + $0xa0] sm:$0xff] %vm1634_vm1, %v1606_v1  ;;  %v1453_v49 = vadd.f32 %v1452_v18, %v1148_v63 }
 0x21e   : > { %v1152_v24 = vpop.f32.mrb[92].mxu1  ;;  %v1457_v20 = vpop.f32.mrb[92].mxu0 }
 0x21f   : > { %v1607_v47 = vadd.f32 %v1453_v49, %v259_v57  ;;  %v1153_v14 = vadd.f32 %v1152_v24, %v2949_v12  ;;  %v1154_v27 = vpop.f32.mrb[93].mxu1  ;;  %v1459_v25 = vpop.f32.mrb[93].mxu0  ;;  %v261_v12 = vld [vmem:[%s3359_s2 + $0xb8] sm:$0xff] }
 0x221   : > { %1656 = vst.msk [vmem:[%s3359_s2 + $0xa8] sm:$0xff] %vm1634_vm1, %v1607_v47  ;;  %v1458_v26 = vadd.f32 %v1457_v20, %v1153_v14 }
 0x222   : > { %v1157_v32 = vpop.f32.mrb[94].mxu1  ;;  %v1462_v8 = vpop.f32.mrb[94].mxu0 }
 0x223   : > { %v1608_v59 = vadd.f32 %v1458_v26, %v260_v4  ;;  %v1158_v33 = vadd.f32 %v1157_v32, %v2953_v22  ;;  %v1159_v29 = vpop.f32.mrb[95].mxu1  ;;  %v1464_v31 = vpop.f32.mrb[95].mxu0  ;;  %v262_v22 = vld [vmem:[%s3359_s2 + $0xc0] sm:$0xff] }
 0x225   : > { %1657 = vst.msk [vmem:[%s3359_s2 + $0xb0] sm:$0xff] %vm1634_vm1, %v1608_v59  ;;  %v1463_v37 = vadd.f32 %v1462_v8, %v1158_v33 }
 0x226   : > { %v1162_v34 = vpop.f32.mrb[96].mxu1  ;;  %v1467_v35 = vpop.f32.mrb[96].mxu0 }
 0x227   : > { %v1609_v55 = vadd.f32 %v1463_v37, %v261_v12  ;;  %v1163_v42 = vadd.f32 %v1162_v34, %v2789_v46  ;;  %v1164_v43 = vpop.f32.mrb[97].mxu1  ;;  %v1469_v41 = vpop.f32.mrb[97].mxu0  ;;  %v263_v46 = vld [vmem:[%s3359_s2 + $0xc8] sm:$0xff] }
 0x229   : > { %1658 = vst.msk [vmem:[%s3359_s2 + $0xb8] sm:$0xff] %vm1634_vm1, %v1609_v55  ;;  %v1468_v6 = vadd.f32 %v1467_v35, %v1163_v42 }
 0x22a   : > { %v1167_v52 = vpop.f32.mrb[98].mxu1  ;;  %v1472_v51 = vpop.f32.mrb[98].mxu0 }
 0x22b   : > { %v1610_v16 = vadd.f32 %v1468_v6, %v262_v22  ;;  %v1168_v39 = vadd.f32 %v1167_v52, %v2797_v54  ;;  %v1169_v53 = vpop.f32.mrb[99].mxu1  ;;  %v1474_v60 = vpop.f32.mrb[99].mxu0  ;;  %v264_v54 = vld [vmem:[%s3359_s2 + $0xd0] sm:$0xff] }
 0x22d   : > { %1659 = vst.msk [vmem:[%s3359_s2 + $0xc0] sm:$0xff] %vm1634_vm1, %v1610_v16  ;;  %v1473_v45 = vadd.f32 %v1472_v51, %v1168_v39 }
 0x22e   : > { %v1172_v61 = vpop.f32.mrb[100].mxu1  ;;  %v1477_v9 = vpop.f32.mrb[100].mxu0 }
 0x22f   : > { %v1611_v18 = vadd.f32 %v1473_v45, %v263_v46  ;;  %v1173_v1 = vadd.f32 %v1172_v61, %v2805_v62  ;;  %v1174_v63 = vpop.f32.mrb[101].mxu1  ;;  %v1479_v10 = vpop.f32.mrb[101].mxu0  ;;  %v265_v62 = vld [vmem:[%s3359_s2 + $0xd8] sm:$0xff] }
 0x231   : > { %1660 = vst.msk [vmem:[%s3359_s2 + $0xc8] sm:$0xff] %vm1634_vm1, %v1611_v18  ;;  %v1478_v19 = vadd.f32 %v1477_v9, %v1173_v1 }
 0x232   : > { %v1177_v57 = vpop.f32.mrb[102].mxu1  ;;  %v1482_v49 = vpop.f32.mrb[102].mxu0 }
 0x233   : > { %v1612_v24 = vadd.f32 %v1478_v19, %v264_v54  ;;  %v1178_v20 = vadd.f32 %v1177_v57, %v2813_v7  ;;  %v1179_v47 = vpop.f32.mrb[103].mxu1  ;;  %v1484_v14 = vpop.f32.mrb[103].mxu0  ;;  %v266_v7 = vld [vmem:[%s3359_s2 + $0xe0] sm:$0xff] }
 0x235   : > { %1661 = vst.msk [vmem:[%s3359_s2 + $0xd0] sm:$0xff] %vm1634_vm1, %v1612_v24  ;;  %v1483_v27 = vadd.f32 %v1482_v49, %v1178_v20 }
 0x236   : > { %v1182_v25 = vpop.f32.mrb[104].mxu1  ;;  %v1487_v4 = vpop.f32.mrb[104].mxu0 }
 0x237   : > { %v1613_v26 = vadd.f32 %v1483_v27, %v265_v62  ;;  %v1183_v32 = vadd.f32 %v1182_v25, %v2821_v15  ;;  %v1184_v8 = vpop.f32.mrb[105].mxu1  ;;  %v1489_v59 = vpop.f32.mrb[105].mxu0  ;;  %v267_v15 = vld [vmem:[%s3359_s2 + $0xe8] sm:$0xff] }
 0x239   : > { %1662 = vst.msk [vmem:[%s3359_s2 + $0xd8] sm:$0xff] %vm1634_vm1, %v1613_v26  ;;  %v1488_v33 = vadd.f32 %v1487_v4, %v1183_v32 }
 0x23a   : > { %v1187_v29 = vpop.f32.mrb[106].mxu1  ;;  %v1492_v31 = vpop.f32.mrb[106].mxu0 }
 0x23b   : > { %v1614_v12 = vadd.f32 %v1488_v33, %v266_v7  ;;  %v1188_v37 = vadd.f32 %v1187_v29, %v2829_v23  ;;  %v1189_v34 = vpop.f32.mrb[107].mxu1  ;;  %v1494_v35 = vpop.f32.mrb[107].mxu0  ;;  %v268_v23 = vld [vmem:[%s3359_s2 + $0xf0] sm:$0xff] }
 0x23d   : > { %1663 = vst.msk [vmem:[%s3359_s2 + $0xe0] sm:$0xff] %vm1634_vm1, %v1614_v12  ;;  %v1493_v55 = vadd.f32 %v1492_v31, %v1188_v37 }
 0x23e   : > { %v1192_v42 = vpop.f32.mrb[108].mxu1  ;;  %v1497_v43 = vpop.f32.mrb[108].mxu0 }
 0x23f   : > { %v1615_v41 = vadd.f32 %v1493_v55, %v267_v15  ;;  %v1193_v22 = vadd.f32 %v1192_v42, %v2837_v30  ;;  %v1194_v6 = vpop.f32.mrb[109].mxu1  ;;  %v1499_v52 = vpop.f32.mrb[109].mxu0  ;;  %v269_v30 = vld [vmem:[%s3359_s2 + $0xf8] sm:$0xff] }
 0x241   : > { %1664 = vst.msk [vmem:[%s3359_s2 + $0xe8] sm:$0xff] %vm1634_vm1, %v1615_v41  ;;  %v1498_v51 = vadd.f32 %v1497_v43, %v1193_v22 }
 0x242   : > { %v1197_v16 = vpop.f32.mrb[110].mxu1  ;;  %v1502_v39 = vpop.f32.mrb[110].mxu0 }
 0x243   : > { %v1616_v53 = vadd.f32 %v1498_v51, %v268_v23  ;;  %v1198_v60 = vadd.f32 %v1197_v16, %v2845_v38  ;;  %v1199_v46 = vpop.f32.mrb[111].mxu1  ;;  %v1504_v45 = vpop.f32.mrb[111].mxu0  ;;  %v270_v38 = vld [vmem:[%s3359_s2 + $0x100] sm:$0xff] }
 0x245   : > { %1665 = vst.msk [vmem:[%s3359_s2 + $0xf0] sm:$0xff] %vm1634_vm1, %v1616_v53  ;;  %v1503_v61 = vadd.f32 %v1502_v39, %v1198_v60 }
 0x246   : > { %v1202_v9 = vpop.f32.mrb[112].mxu1  ;;  %v1507_v18 = vpop.f32.mrb[112].mxu0 }
 0x247   : > { %v1617_v1 = vadd.f32 %v1503_v61, %v269_v30  ;;  %v1203_v63 = vadd.f32 %v1202_v9, %v2853_v48  ;;  %v1204_v10 = vpop.f32.mrb[113].mxu1  ;;  %v1509_v54 = vpop.f32.mrb[113].mxu0  ;;  %v271_v48 = vld [vmem:[%s3359_s2 + $0x108] sm:$0xff] }
 0x249   : > { %1666 = vst.msk [vmem:[%s3359_s2 + $0xf8] sm:$0xff] %vm1634_vm1, %v1617_v1  ;;  %v1508_v19 = vadd.f32 %v1507_v18, %v1203_v63 }
 0x24a   : > { %v1207_v57 = vpop.f32.mrb[114].mxu1  ;;  %v1512_v49 = vpop.f32.mrb[114].mxu0 }
 0x24b   : > { %v1618_v24 = vadd.f32 %v1508_v19, %v270_v38  ;;  %v1208_v20 = vadd.f32 %v1207_v57, %v2861_v58  ;;  %v1209_v47 = vpop.f32.mrb[115].mxu1  ;;  %v1514_v14 = vpop.f32.mrb[115].mxu0  ;;  %v272_v58 = vld [vmem:[%s3359_s2 + $0x110] sm:$0xff] }
 0x24d   : > { %1667 = vst.msk [vmem:[%s3359_s2 + $0x100] sm:$0xff] %vm1634_vm1, %v1618_v24  ;;  %v1513_v62 = vadd.f32 %v1512_v49, %v1208_v20 }
 0x24e   : > { %v1212_v27 = vpop.f32.mrb[116].mxu1  ;;  %v1517_v25 = vpop.f32.mrb[116].mxu0 }
 0x24f   : > { %v1619_v4 = vadd.f32 %v1513_v62, %v271_v48  ;;  %v1213_v26 = vadd.f32 %v1212_v27, %v2869_v5  ;;  %v1214_v32 = vpop.f32.mrb[117].mxu1  ;;  %v1519_v8 = vpop.f32.mrb[117].mxu0  ;;  %v273_v5 = vld [vmem:[%s3359_s2 + $0x118] sm:$0xff] }
 0x251   : > { %1668 = vst.msk [vmem:[%s3359_s2 + $0x108] sm:$0xff] %vm1634_vm1, %v1619_v4  ;;  %v1518_v59 = vadd.f32 %v1517_v25, %v1213_v26 }
 0x252   : > { %v1217_v7 = vpop.f32.mrb[118].mxu1  ;;  %v1522_v33 = vpop.f32.mrb[118].mxu0 }
 0x253   : > { %v1620_v29 = vadd.f32 %v1518_v59, %v272_v58  ;;  %v1218_v31 = vadd.f32 %v1217_v7, %v2877_v17  ;;  %v1219_v12 = vpop.f32.mrb[119].mxu1  ;;  %v1524_v37 = vpop.f32.mrb[119].mxu0  ;;  %v274_v17 = vld [vmem:[%s3359_s2 + $0x120] sm:$0xff] }
 0x255   : > { %1669 = vst.msk [vmem:[%s3359_s2 + $0x110] sm:$0xff] %vm1634_vm1, %v1620_v29  ;;  %v1523_v34 = vadd.f32 %v1522_v33, %v1218_v31 }
 0x256   : > { %v1222_v35 = vpop.f32.mrb[120].mxu1  ;;  %v1527_v15 = vpop.f32.mrb[120].mxu0 }
 0x257   : > { %v1621_v55 = vadd.f32 %v1523_v34, %v273_v5  ;;  %v1223_v42 = vadd.f32 %v1222_v35, %v2885_v3  ;;  %v1224_v43 = vpop.f32.mrb[121].mxu1  ;;  %v1529_v41 = vpop.f32.mrb[121].mxu0  ;;  %v275_v3 = vld [vmem:[%s3359_s2 + $0x128] sm:$0xff] }
 0x259   : > { %1670 = vst.msk [vmem:[%s3359_s2 + $0x118] sm:$0xff] %vm1634_vm1, %v1621_v55  ;;  %v1528_v22 = vadd.f32 %v1527_v15, %v1223_v42 }
 0x25a   : > { %v1227_v6 = vpop.f32.mrb[122].mxu1  ;;  %v1532_v52 = vpop.f32.mrb[122].mxu0 }
 0x25b   : > { %v1622_v23 = vadd.f32 %v1528_v22, %v274_v17  ;;  %v1228_v51 = vadd.f32 %v1227_v6, %v2893_v36  ;;  %v1229_v16 = vpop.f32.mrb[123].mxu1  ;;  %v1534_v39 = vpop.f32.mrb[123].mxu0  ;;  %v276_v36 = vld [vmem:[%s3359_s2 + $0x130] sm:$0xff] }
 0x25d   : > { %1671 = vst.msk [vmem:[%s3359_s2 + $0x120] sm:$0xff] %vm1634_vm1, %v1622_v23  ;;  %v1533_v53 = vadd.f32 %v1532_v52, %v1228_v51 }
 0x25e   : > { %v1232_v60 = vpop.f32.mrb[124].mxu1  ;;  %v1537_v46 = vpop.f32.mrb[124].mxu0 }
 0x25f   : > { %v1623_v45 = vadd.f32 %v1533_v53, %v275_v3  ;;  %v1233_v30 = vadd.f32 %v1232_v60, %v2901_v50  ;;  %v1234_v61 = vpop.f32.mrb[125].mxu1  ;;  %v1539_v9 = vpop.f32.mrb[125].mxu0  ;;  %v277_v50 = vld [vmem:[%s3359_s2 + $0x138] sm:$0xff] }
 0x261   : > { %1672 = vst.msk [vmem:[%s3359_s2 + $0x128] sm:$0xff] %vm1634_vm1, %v1623_v45  ;;  %v1538_v18 = vadd.f32 %v1537_v46, %v1233_v30 }
 0x262   : > { %v1237_v1 = vpop.f32.mrb[126].mxu1  ;;  %v1542_v63 = vpop.f32.mrb[126].mxu0 }
 0x263   : > { %v1624_v10 = vadd.f32 %v1538_v18, %v276_v36  ;;  %v1238_v54 = vadd.f32 %v1237_v1, %v2909_v0  ;;  %v1239_v38 = vpop.f32.mrb[127].mxu1  ;;  %v1544_v19 = vpop.f32.mrb[127].mxu0  ;;  %v278_v0 = vld [vmem:[%s3359_s2 + $0x140] sm:$0xff] }
 0x265   : > { %1673 = vst.msk [vmem:[%s3359_s2 + $0x130] sm:$0xff] %vm1634_vm1, %v1624_v10  ;;  %v1543_v57 = vadd.f32 %v1542_v63, %v1238_v54 }
 0x266   : > { %v1242_v49 = vpop.f32.mrb[128].mxu1  ;;  %v1547_v24 = vpop.f32.mrb[128].mxu0 }
 0x267   : > { %v1625_v20 = vadd.f32 %v1543_v57, %v277_v50  ;;  %v1243_v47 = vadd.f32 %v1242_v49, %v2917_v13  ;;  %v1244_v14 = vpop.f32.mrb[129].mxu1  ;;  %v1549_v48 = vpop.f32.mrb[129].mxu0  ;;  %v279_v13 = vld [vmem:[%s3359_s2 + $0x148] sm:$0xff] }
 0x269   : > { %1674 = vst.msk [vmem:[%s3359_s2 + $0x138] sm:$0xff] %vm1634_vm1, %v1625_v20  ;;  %v1548_v62 = vadd.f32 %v1547_v24, %v1243_v47 }
 0x26a   : > { %v1247_v27 = vpop.f32.mrb[130].mxu1  ;;  %v1552_v25 = vpop.f32.mrb[130].mxu0 }
 0x26b   : > { %v1626_v4 = vadd.f32 %v1548_v62, %v278_v0  ;;  %v1248_v26 = vadd.f32 %v1247_v27, %v2925_v28  ;;  %v1249_v32 = vpop.f32.mrb[131].mxu1  ;;  %v1554_v8 = vpop.f32.mrb[131].mxu0  ;;  %v280_v28 = vld [vmem:[%s3359_s2 + $0x150] sm:$0xff] }
 0x26d   : > { %1675 = vst.msk [vmem:[%s3359_s2 + $0x140] sm:$0xff] %vm1634_vm1, %v1626_v4  ;;  %v1553_v58 = vadd.f32 %v1552_v25, %v1248_v26 }
 0x26e   : > { %v1252_v59 = vpop.f32.mrb[132].mxu1  ;;  %v1557_v7 = vpop.f32.mrb[132].mxu0 }
 0x26f   : > { %v1627_v33 = vadd.f32 %v1553_v58, %v279_v13  ;;  %v1253_v29 = vadd.f32 %v1252_v59, %v2931_v40  ;;  %v1254_v31 = vpop.f32.mrb[133].mxu1  ;;  %v1559_v12 = vpop.f32.mrb[133].mxu0  ;;  %v281_v40 = vld [vmem:[%s3359_s2 + $0x158] sm:$0xff] }
 0x271   : > { %1676 = vst.msk [vmem:[%s3359_s2 + $0x148] sm:$0xff] %vm1634_vm1, %v1627_v33  ;;  %v1558_v37 = vadd.f32 %v1557_v7, %v1253_v29 }
 0x272   : > { %v1257_v5 = vpop.f32.mrb[134].mxu1  ;;  %v1562_v34 = vpop.f32.mrb[134].mxu0 }
 0x273   : > { %v1628_v35 = vadd.f32 %v1558_v37, %v280_v28  ;;  %v1258_v15 = vadd.f32 %v1257_v5, %v2935_v44  ;;  %v1259_v55 = vpop.f32.mrb[135].mxu1  ;;  %v1564_v42 = vpop.f32.mrb[135].mxu0  ;;  %v282_v44 = vld [vmem:[%s3359_s2 + $0x160] sm:$0xff] }
 0x275   : > { %1677 = vst.msk [vmem:[%s3359_s2 + $0x150] sm:$0xff] %vm1634_vm1, %v1628_v35  ;;  %v1563_v43 = vadd.f32 %v1562_v34, %v1258_v15 }
 0x276   : > { %v1262_v41 = vpop.f32.mrb[136].mxu1  ;;  %v1567_v17 = vpop.f32.mrb[136].mxu0 }
 0x277   : > { %v1629_v22 = vadd.f32 %v1563_v43, %v281_v40  ;;  %v1263_v6 = vadd.f32 %v1262_v41, %v2939_v56  ;;  %v1264_v52 = vpop.f32.mrb[137].mxu1  ;;  %v1569_v23 = vpop.f32.mrb[137].mxu0  ;;  %v283_v56 = vld [vmem:[%s3359_s2 + $0x168] sm:$0xff] }
 0x279   : > { %1678 = vst.msk [vmem:[%s3359_s2 + $0x158] sm:$0xff] %vm1634_vm1, %v1629_v22  ;;  %v1568_v51 = vadd.f32 %v1567_v17, %v1263_v6 }
 0x27a   : > { %v1267_v16 = vpop.f32.mrb[138].mxu1  ;;  %v1572_v39 = vpop.f32.mrb[138].mxu0 }
 0x27b   : > { %v1630_v3 = vadd.f32 %v1568_v51, %v282_v44  ;;  %v1268_v53 = vadd.f32 %v1267_v16, %v2943_v2  ;;  %v1269_v60 = vpop.f32.mrb[139].mxu1  ;;  %v1574_v46 = vpop.f32.mrb[139].mxu0  ;;  %v284_v2 = vld [vmem:[%s3359_s2 + $0x170] sm:$0xff] }
 0x27d   : > { %1679 = vst.msk [vmem:[%s3359_s2 + $0x160] sm:$0xff] %vm1634_vm1, %v1630_v3  ;;  %v1573_v45 = vadd.f32 %v1572_v39, %v1268_v53 }
 0x27e   : > { %v1272_v30 = vpop.f32.mrb[140].mxu1  ;;  %v1577_v61 = vpop.f32.mrb[140].mxu0 }
 0x27f   : > { %v1631_v9 = vadd.f32 %v1573_v45, %v283_v56  ;;  %v1273_v36 = vadd.f32 %v1272_v30, %v2947_v11  ;;  %v1274_v18 = vpop.f32.mrb[141].mxu1  ;;  %v1579_v1 = vpop.f32.mrb[141].mxu0  ;;  %v285_v11 = vld [vmem:[%s3359_s2 + $0x178] sm:$0xff] }
 0x281   : > { %1680 = vst.msk [vmem:[%s3359_s2 + $0x168] sm:$0xff] %vm1634_vm1, %v1631_v9  ;;  %v1578_v63 = vadd.f32 %v1577_v61, %v1273_v36 }
 0x282   : > { %v1277_v10 = vpop.f32.mrb[142].mxu1  ;;  %v1582_v54 = vpop.f32.mrb[142].mxu0 }
 0x283   : > { %v1632_v38 = vadd.f32 %v1578_v63, %v284_v2  ;;  %v1278_v19 = vadd.f32 %v1277_v10, %v2951_v21  ;;  %v1279_v50 = vpop.f32.mrb[143].mxu1  ;;  %v1584_v57 = vpop.f32.mrb[143].mxu0 }
 0x285   : > { %1681 = vst.msk [vmem:[%s3359_s2 + $0x170] sm:$0xff] %vm1634_vm1, %v1632_v38  ;;  %v1583_v49 = vadd.f32 %v1582_v54, %v1278_v19 }
 0x287   : > { %v1633_v24 = vadd.f32 %v1583_v49, %v285_v11 }
 0x289   : > { %1682 = vst.msk [vmem:[%s3359_s2 + $0x178] sm:$0xff] %vm1634_vm1, %v1633_v24 }
 0x28a PF: > { %s15_s14 = sadd.s32 1, %s2090_s14   ;;  %s3363_s9 = smov %s2074_s10 }
 0x28b   : > { %p12_p7 = scmp.ge.s32.totalorder %s15_s14, 5   ;;  %s3364_s10 = smov %s2078_s11 }
 0x28c   : > { %s3365_s11 = smov %s2158_s20  ;;  %s3366_s12 = smov %s2086_s13 }
 0x28d   : > { %s3367_s13 = smov %s3369_s16  ;;  %14 = sbr.rel (!%p12_p7) target bundleno = 4 (0x4), region = 73 }
 0x294   :  { %1705 = vsyncpa [#allocation3], 1 }
 0x295   :  { %1707 = vsyncpa [#allocation3 + $0x1], 1 }

</bundles_post_ra>
